<compile_context>
chip_gen: v7x
topology: tpu7x:2x2x1
jax: 0.10.0
libtpu: 0.0.40
codegen_flags: <defaults>
</compile_context>

<pallas_src>
import math
import functools

import jax
import jax.numpy as jnp
from jax.experimental import pallas as pl
from jax.experimental.pallas import tpu as pltpu


# ---------------------------------------------------------------------------
# Kernel helpers
# ---------------------------------------------------------------------------
def _layer_norm(x, alpha, bias, eps=1e-6):
    # Matches the tutorial-style torch Norm: alpha*(x-mean)/(std_unbiased+eps)+bias
    d = x.shape[-1]
    mean = jnp.mean(x, axis=-1, keepdims=True)
    centered = x - mean
    var = jnp.sum(centered * centered, axis=-1, keepdims=True) / (d - 1)
    inv = pl.reciprocal(jnp.sqrt(var) + eps, approx=True)   # EUP, frees VPU divides
    return alpha * centered * inv + bias


def encoder_kernel(x_ref, mask_ref,
                   a1_ref, b1_ref, a2_ref, b2_ref,
                   wqkv_ref, bqkv_ref, woh_ref, bo_ref,
                   w1_ref, bf1_ref, w2_ref, bf2_ref,
                   af_ref, bfin_ref,
                   out_ref, x_acc, *, n_layers, heads):
    l = pl.program_id(1)

    # Load the embedded input into the resident activation scratch on layer 0.
    @pl.when(l == 0)
    def _():
        x_acc[...] = x_ref[0].astype(jnp.float32)

    x = x_acc[...]                                  # (S, D) f32 carried across layers
    S, D = x.shape
    dk = D // heads
    scale = 1.0 / math.sqrt(dk)

    # Additive mask bias: 0 where kept, -1e9 where masked (replaces cmp+select).
    mask_bias = (mask_ref[0, 0] - 1.0) * 1e9        # (S,) f32
    mask_bias = mask_bias[None, None, :]            # broadcasts over (H, Sq, Sk)

    # ---- self-attention sublayer (pre-norm, residual) ----
    x2 = _layer_norm(x, a1_ref[0], b1_ref[0])
    qkv = jnp.dot(x2.astype(jnp.bfloat16), wqkv_ref[0],
                  preferred_element_type=jnp.float32) + bqkv_ref[0]      # (S, 3D) f32
    # head-major layout: (S, 3H, dk) -> (3H, S, dk)
    qkv_h = pltpu.einshape("shd->hsd", qkv.reshape(S, 3 * heads, dk))
    q = qkv_h[:heads].astype(jnp.bfloat16)          # (H, S, dk)
    k = qkv_h[heads:2 * heads].astype(jnp.bfloat16)
    v = qkv_h[2 * heads:].astype(jnp.bfloat16)

    sc = jnp.einsum('hqd,hkd->hqk', q, k,
                    preferred_element_type=jnp.float32) * scale + mask_bias
    sc = sc - jnp.max(sc, axis=-1, keepdims=True)
    p = jnp.exp(sc)
    p = p * pl.reciprocal(jnp.sum(p, axis=-1, keepdims=True), approx=True)

    ctx = jnp.einsum('hqk,hkd->hqd', p.astype(jnp.bfloat16), v,
                     preferred_element_type=jnp.float32)                  # (H, S, dk)
    # Output projection folded per head (avoids transposing back): Wo is (H, dk, D).
    attn = jnp.einsum('hsd,hdm->hsm', ctx.astype(jnp.bfloat16), woh_ref[0],
                      preferred_element_type=jnp.float32)                 # (H, S, D)
    attn = jnp.sum(attn, axis=0) + bo_ref[0]                              # (S, D)
    x = x + attn                                                          # dropout == identity

    # ---- feed-forward sublayer (pre-norm, residual) ----
    x2 = _layer_norm(x, a2_ref[0], b2_ref[0])
    h1 = jnp.dot(x2.astype(jnp.bfloat16), w1_ref[0],
                 preferred_element_type=jnp.float32) + bf1_ref[0]
    h1 = jnp.maximum(h1, 0.0)                                             # ReLU
    ff = jnp.dot(h1.astype(jnp.bfloat16), w2_ref[0],
                 preferred_element_type=jnp.float32) + bf2_ref[0]
    x = x + ff

    x_acc[...] = x

    @pl.when(l == n_layers - 1)
    def _():
        out_ref[0] = _layer_norm(x, af_ref[0], bfin_ref[0]).astype(out_ref.dtype)


# ---------------------------------------------------------------------------
# Wrapper
# ---------------------------------------------------------------------------
def encoder_forward(x_emb, mask, params, *, n_layers, heads):
    B, S, D = x_emb.shape
    d_ff = params["w1"].shape[-1]
    dk = D // heads

    # ---- wrapper-side layout plumbing: fused bf16 QKV, head-major Wo, (L,1,dim) vectors
    wqkv = jnp.concatenate([params["wq"], params["wk"], params["wv"]],
                           axis=-1).astype(jnp.bfloat16)                  # (L, D, 3D)
    bqkv = jnp.concatenate([params["bq"], params["bk"], params["bv"]],
                           axis=-1).reshape(n_layers, 1, 3 * D).astype(jnp.float32)
    woh = params["wo"].reshape(n_layers, heads, dk, D).astype(jnp.bfloat16)
    w1 = params["w1"].astype(jnp.bfloat16)
    w2 = params["w2"].astype(jnp.bfloat16)

    def pvec(p):
        return p.reshape(n_layers, 1, -1).astype(jnp.float32)

    a1, b1 = pvec(params["a1"]), pvec(params["b1n"])
    a2, b2 = pvec(params["a2"]), pvec(params["b2n"])
    bo, bf1, bf2 = pvec(params["bo"]), pvec(params["bf1"]), pvec(params["bf2"])

    mask3 = mask.reshape(B, 1, S).astype(jnp.float32)

    def wspec(shape):   # per-layer weight block, indexed by the layer grid axis
        nrest = len(shape) - 1
        return pl.BlockSpec((1,) + tuple(shape[1:]),
                            lambda b, l: (l,) + (0,) * nrest)

    in_specs = [
        pl.BlockSpec((1, S, D), lambda b, l: (b, 0, 0)),   # x (per-batch block)
        pl.BlockSpec((1, 1, S), lambda b, l: (b, 0, 0)),   # mask
        wspec(a1.shape), wspec(b1.shape),                  # norm1 alpha/bias
        wspec(a2.shape), wspec(b2.shape),                  # norm2 alpha/bias
        wspec(wqkv.shape), wspec(bqkv.shape),              # fused QKV
        wspec(woh.shape), wspec(bo.shape),                 # Wo (head-major), bo
        wspec(w1.shape), wspec(bf1.shape),                 # FF W1, b1
        wspec(w2.shape), wspec(bf2.shape),                 # FF W2, b2
        pl.BlockSpec((1, D), lambda b, l: (0, 0)),         # final norm alpha
        pl.BlockSpec((1, D), lambda b, l: (0, 0)),         # final norm bias
    ]

    # VMEM budget: 2x (double-buffered) one layer of weights + resident activation + I/O blocks.
    bf16_w = 2 * (D * 3 * D + D * D + D * d_ff + d_ff * D)
    f32_p = 4 * (3 * D + D + d_ff + D + 4 * D + 2 * D)
    act = 4 * S * D
    io = 2 * (4 * S * D + 4 * S) + 2 * 4 * S * D
    est = 2 * (bf16_w + f32_p) + act + io
    vmem_limit = int(min(max(3 * est + (4 << 20), 16 << 20), 48 << 20))

    return pl.pallas_call(
        functools.partial(encoder_kernel, n_layers=n_layers, heads=heads),
        out_shape=jax.ShapeDtypeStruct((B, S, D), jnp.float32),
        grid_spec=pltpu.PrefetchScalarGridSpec(
            num_scalar_prefetch=0,
            grid=(B, n_layers),                            # batch outer, layers inner
            in_specs=in_specs,
            out_specs=pl.BlockSpec((1, S, D), lambda b, l: (b, 0, 0)),
            scratch_shapes=[pltpu.VMEM((S, D), jnp.float32)],
        ),
        compiler_params=pltpu.CompilerParams(
            dimension_semantics=("parallel", "arbitrary"),
            vmem_limit_bytes=vmem_limit),
    )(x_emb, mask3, a1, b1, a2, b2, wqkv, bqkv, woh, bo, w1, bf1, w2, bf2,
      params["alpha_f"], params["bias_f"])


# ---------------------------------------------------------------------------
# Parameter init + embedding glue (deterministic, synthetic weights)
# ---------------------------------------------------------------------------
def init_params(key, *, n_layers, d_model, d_ff, vocab_size):
    ks = jax.random.split(key, 8)
    s = 0.02
    return {
        "embed": jax.random.normal(ks[0], (vocab_size, d_model), jnp.float32) * s,
        "a1":  jnp.ones((n_layers, d_model), jnp.float32),
        "b1n": jnp.zeros((n_layers, d_model), jnp.float32),
        "a2":  jnp.ones((n_layers, d_model), jnp.float32),
        "b2n": jnp.zeros((n_layers, d_model), jnp.float32),
        "wq": jax.random.normal(ks[1], (n_layers, d_model, d_model), jnp.float32) * s,
        "bq": jnp.zeros((n_layers, d_model), jnp.float32),
        "wk": jax.random.normal(ks[2], (n_layers, d_model, d_model), jnp.float32) * s,
        "bk": jnp.zeros((n_layers, d_model), jnp.float32),
        "wv": jax.random.normal(ks[3], (n_layers, d_model, d_model), jnp.float32) * s,
        "bv": jnp.zeros((n_layers, d_model), jnp.float32),
        "wo": jax.random.normal(ks[4], (n_layers, d_model, d_model), jnp.float32) * s,
        "bo": jnp.zeros((n_layers, d_model), jnp.float32),
        "w1": jax.random.normal(ks[5], (n_layers, d_model, d_ff), jnp.float32) * s,
        "bf1": jnp.zeros((n_layers, d_ff), jnp.float32),
        "w2": jax.random.normal(ks[6], (n_layers, d_ff, d_model), jnp.float32) * s,
        "bf2": jnp.zeros((n_layers, d_model), jnp.float32),
        "alpha_f": jnp.ones((1, d_model), jnp.float32),
        "bias_f":  jnp.zeros((1, d_model), jnp.float32),
    }


def make_positional_encoding(max_seq_len, d_model):
    pos = jnp.arange(max_seq_len, dtype=jnp.float32)[:, None]
    i = jnp.arange(0, d_model, 2, dtype=jnp.float32)
    div = jnp.power(10000.0, i / d_model)
    pe = jnp.zeros((max_seq_len, d_model), jnp.float32)
    pe = pe.at[:, 0::2].set(jnp.sin(pos / div))
    pe = pe.at[:, 1::2].set(jnp.cos(pos / div))
    return pe


def embed(src, table, pe, embed_dim):
    # TODO(synk): embedding-table gather kept in plain JAX (data-dependent gather glue).
    x = table[src] * math.sqrt(embed_dim)       # (B, S, D), scaled as in the tutorial
    x = x + pe[: src.shape[1]][None]            # sinusoidal positional encoding
    return x                                    # dropout == identity at inference


# ---------------------------------------------------------------------------
# Demo
# ---------------------------------------------------------------------------
if __name__ == "__main__":
    vocab_size, embed_dim, d_model = 50, 32, 32
    n_layers, heads, d_ff, max_seq_len = 2, 4, 64, 16
    B, S = 2, 8

    key = jax.random.PRNGKey(0)
    k_param, k_src = jax.random.split(key)

    params = init_params(k_param, n_layers=n_layers, d_model=d_model,
                         d_ff=d_ff, vocab_size=vocab_size)
    pe = make_positional_encoding(max_seq_len, d_model)

    src = jax.random.randint(k_src, (B, S), 0, vocab_size, dtype=jnp.int32)
    lengths = jnp.array([S, 5], dtype=jnp.int32)
    mask = (jnp.arange(S)[None, :] < lengths[:, None]).astype(jnp.float32)  # (B, S)

    x_emb = embed(src, params["embed"], pe, embed_dim)                      # (B, S, D)
    out = encoder_forward(x_emb, mask, params, n_layers=n_layers, heads=heads)
    out = jax.block_until_ready(out)

    assert out.shape == (B, S, d_model) and out.dtype == jnp.float32
    assert bool(jnp.all(jnp.isfinite(out)))
    print("KERNEL_OK")
</pallas_src>

<mosaic_0001>
module attributes {stable_mosaic.version = 11 : i64} {
  func.func @encoder_kernel(%arg0: i32, %arg1: i32, %arg2: memref<1x8x32xf32, #tpu.memory_space<vmem>>, %arg3: memref<1x1x8xf32, #tpu.memory_space<vmem>>, %arg4: memref<1x1x32xf32, #tpu.memory_space<vmem>>, %arg5: memref<1x1x32xf32, #tpu.memory_space<vmem>>, %arg6: memref<1x1x32xf32, #tpu.memory_space<vmem>>, %arg7: memref<1x1x32xf32, #tpu.memory_space<vmem>>, %arg8: memref<1x32x96xbf16, #tpu.memory_space<vmem>>, %arg9: memref<1x1x96xf32, #tpu.memory_space<vmem>>, %arg10: memref<1x4x8x32xbf16, #tpu.memory_space<vmem>>, %arg11: memref<1x1x32xf32, #tpu.memory_space<vmem>>, %arg12: memref<1x32x64xbf16, #tpu.memory_space<vmem>>, %arg13: memref<1x1x64xf32, #tpu.memory_space<vmem>>, %arg14: memref<1x64x32xbf16, #tpu.memory_space<vmem>>, %arg15: memref<1x1x32xf32, #tpu.memory_space<vmem>>, %arg16: memref<1x32xf32, #tpu.memory_space<vmem>>, %arg17: memref<1x32xf32, #tpu.memory_space<vmem>>, %arg18: memref<1x8x32xf32, #tpu.memory_space<vmem>>, %arg19: memref<8x32xf32, #tpu.memory_space<vmem>>) attributes {dimension_semantics = [#tpu.dimension_semantics<parallel>, #tpu.dimension_semantics<arbitrary>], iteration_bounds = array<i64: 2, 2>, scalar_prefetch = 0 : i64, scratch_operands = 1 : i64, tpu.core_type = #tpu.core_type<tc>, window_params = [{transform_indices = @transform_0, window_bounds = array<i64: 1, 8, 32>}, {transform_indices = @transform_1, window_bounds = array<i64: 1, 1, 8>}, {transform_indices = @transform_2, window_bounds = array<i64: 1, 1, 32>}, {transform_indices = @transform_3, window_bounds = array<i64: 1, 1, 32>}, {transform_indices = @transform_4, window_bounds = array<i64: 1, 1, 32>}, {transform_indices = @transform_5, window_bounds = array<i64: 1, 1, 32>}, {transform_indices = @transform_6, window_bounds = array<i64: 1, 32, 96>}, {transform_indices = @transform_7, window_bounds = array<i64: 1, 1, 96>}, {transform_indices = @transform_8, window_bounds = array<i64: 1, 4, 8, 32>}, {transform_indices = @transform_9, window_bounds = array<i64: 1, 1, 32>}, {transform_indices = @transform_10, window_bounds = array<i64: 1, 32, 64>}, {transform_indices = @transform_11, window_bounds = array<i64: 1, 1, 64>}, {transform_indices = @transform_12, window_bounds = array<i64: 1, 64, 32>}, {transform_indices = @transform_13, window_bounds = array<i64: 1, 1, 32>}, {pipeline_mode = #tpu.pipeline_mode<synchronous>, transform_indices = @transform_14, window_bounds = array<i64: 1, 32>}, {pipeline_mode = #tpu.pipeline_mode<synchronous>, transform_indices = @transform_15, window_bounds = array<i64: 1, 32>}, {transform_indices = @transform_16, window_bounds = array<i64: 1, 8, 32>}]} {
    %c0_i32 = arith.constant 0 : i32
    %0 = arith.cmpi eq, %arg1, %c0_i32 : i32
    %1 = arith.extui %0 : i1 to i32
    %c0_i32_0 = arith.constant 0 : i32
    %2 = arith.cmpi ne, %1, %c0_i32_0 : i32
    scf.if %2 {
      %c0_67 = arith.constant 0 : index
      %c0_68 = arith.constant 0 : index
      %c0_69 = arith.constant 0 : index
      %127 = vector.load %arg2[%c0_67, %c0_68, %c0_69] : memref<1x8x32xf32, #tpu.memory_space<vmem>>, vector<1x8x32xf32>
      %128 = vector.shape_cast %127 : vector<1x8x32xf32> to vector<8x32xf32>
      %c0_70 = arith.constant 0 : index
      %c0_71 = arith.constant 0 : index
      %129 = vector.load %arg19[%c0_70, %c0_71] : memref<8x32xf32, #tpu.memory_space<vmem>>, vector<8x32xf32>
      tpu.vector_store %arg19[%c0_70, %c0_71], %128 {strides = array<i32>} : memref<8x32xf32, #tpu.memory_space<vmem>>, vector<8x32xf32>,
    } else {
    }
    %c0 = arith.constant 0 : index
    %c0_1 = arith.constant 0 : index
    %3 = vector.load %arg19[%c0, %c0_1] : memref<8x32xf32, #tpu.memory_space<vmem>>, vector<8x32xf32>
    %c0_2 = arith.constant 0 : index
    %c0_3 = arith.constant 0 : index
    %c0_4 = arith.constant 0 : index
    %4 = vector.load %arg3[%c0_2, %c0_3, %c0_4] : memref<1x1x8xf32, #tpu.memory_space<vmem>>, vector<1x1x8xf32>
    %5 = vector.shape_cast %4 : vector<1x1x8xf32> to vector<8xf32>
    %cst = arith.constant 1.000000e+00 : f32
    %6 = vector.broadcast %cst : f32 to vector<8xf32>
    %7 = arith.subf %5, %6 : vector<8xf32>
    %cst_5 = arith.constant 1.000000e+09 : f32
    %8 = vector.broadcast %cst_5 : f32 to vector<8xf32>
    %9 = arith.mulf %7, %8 : vector<8xf32>
    %10 = vector.shape_cast %9 : vector<8xf32> to vector<1x1x8xf32>
    %c0_6 = arith.constant 0 : index
    %c0_7 = arith.constant 0 : index
    %c0_8 = arith.constant 0 : index
    %11 = vector.load %arg4[%c0_6, %c0_7, %c0_8] : memref<1x1x32xf32, #tpu.memory_space<vmem>>, vector<1x1x32xf32>
    %12 = vector.shape_cast %11 : vector<1x1x32xf32> to vector<1x32xf32>
    %c0_9 = arith.constant 0 : index
    %c0_10 = arith.constant 0 : index
    %c0_11 = arith.constant 0 : index
    %13 = vector.load %arg5[%c0_9, %c0_10, %c0_11] : memref<1x1x32xf32, #tpu.memory_space<vmem>>, vector<1x1x32xf32>
    %14 = vector.shape_cast %13 : vector<1x1x32xf32> to vector<1x32xf32>
    %cst_12 = arith.constant dense<0.000000e+00> : vector<8xf32>
    %15 = vector.multi_reduction <add>, %3, %cst_12 [1] : vector<8x32xf32> to vector<8xf32>
    %16 = vector.shape_cast %15 : vector<8xf32> to vector<8x1xf32>
    %cst_13 = arith.constant 3.200000e+01 : f32
    %17 = vector.broadcast %cst_13 : f32 to vector<8x1xf32>
    %18 = arith.divf %16, %17 : vector<8x1xf32>
    %19 = vector.broadcast %18 : vector<8x1xf32> to vector<8x32xf32>
    %20 = arith.subf %3, %19 : vector<8x32xf32>
    %21 = arith.mulf %20, %20 : vector<8x32xf32>
    %cst_14 = arith.constant dense<0.000000e+00> : vector<8xf32>
    %22 = vector.multi_reduction <add>, %21, %cst_14 [1] : vector<8x32xf32> to vector<8xf32>
    %23 = vector.shape_cast %22 : vector<8xf32> to vector<8x1xf32>
    %cst_15 = arith.constant 3.100000e+01 : f32
    %24 = vector.broadcast %cst_15 : f32 to vector<8x1xf32>
    %25 = arith.divf %23, %24 : vector<8x1xf32>
    %26 = math.sqrt %25 : vector<8x1xf32>
    %cst_16 = arith.constant 9.99999997E-7 : f32
    %27 = vector.broadcast %cst_16 : f32 to vector<8x1xf32>
    %28 = arith.addf %26, %27 : vector<8x1xf32>
    %29 = tpu.reciprocal %28 {approx = true} : vector<8x1xf32> -> vector<8x1xf32>
    %30 = vector.broadcast %12 : vector<1x32xf32> to vector<8x32xf32>
    %31 = arith.mulf %30, %20 : vector<8x32xf32>
    %32 = vector.broadcast %29 : vector<8x1xf32> to vector<8x32xf32>
    %33 = arith.mulf %31, %32 : vector<8x32xf32>
    %34 = vector.broadcast %14 : vector<1x32xf32> to vector<8x32xf32>
    %35 = arith.addf %33, %34 : vector<8x32xf32>
    %36 = arith.truncf %35 : vector<8x32xf32> to vector<8x32xbf16>
    %c0_17 = arith.constant 0 : index
    %c0_18 = arith.constant 0 : index
    %c0_19 = arith.constant 0 : index
    %37 = vector.load %arg8[%c0_17, %c0_18, %c0_19] : memref<1x32x96xbf16, #tpu.memory_space<vmem>>, vector<1x32x96xbf16>
    %38 = vector.shape_cast %37 : vector<1x32x96xbf16> to vector<32x96xbf16>
    %cst_20 = arith.constant dense<0.000000e+00> : vector<8x96xf32>
    %39 = tpu.matmul %36, %38, %cst_20 {dimension_numbers = #tpu.dot_dimension_numbers<[1], [0], [0], [1], [0, 0, 1, 1], [], []>} : vector<8x32xbf16>, vector<32x96xbf16>, vector<8x96xf32> -> vector<8x96xf32>
    %c0_21 = arith.constant 0 : index
    %c0_22 = arith.constant 0 : index
    %c0_23 = arith.constant 0 : index
    %40 = vector.load %arg9[%c0_21, %c0_22, %c0_23] : memref<1x1x96xf32, #tpu.memory_space<vmem>>, vector<1x1x96xf32>
    %41 = vector.shape_cast %40 : vector<1x1x96xf32> to vector<1x96xf32>
    %42 = vector.broadcast %41 : vector<1x96xf32> to vector<8x96xf32>
    %43 = arith.addf %39, %42 : vector<8x96xf32>
    %44 = vector.shape_cast %43 : vector<8x96xf32> to vector<8x12x8xf32>
    %45 = tpu.transpose %44, [1, 0, 2] : vector<8x12x8xf32> -> vector<12x8x8xf32>
    %46 = vector.extract_strided_slice %45 {offsets = [0, 0, 0], sizes = [4, 8, 8], strides = [1, 1, 1]} : vector<12x8x8xf32> to vector<4x8x8xf32>
    %47 = arith.truncf %46 : vector<4x8x8xf32> to vector<4x8x8xbf16>
    %48 = vector.extract_strided_slice %45 {offsets = [4, 0, 0], sizes = [4, 8, 8], strides = [1, 1, 1]} : vector<12x8x8xf32> to vector<4x8x8xf32>
    %49 = arith.truncf %48 : vector<4x8x8xf32> to vector<4x8x8xbf16>
    %50 = vector.extract_strided_slice %45 {offsets = [8, 0, 0], sizes = [4, 8, 8], strides = [1, 1, 1]} : vector<12x8x8xf32> to vector<4x8x8xf32>
    %51 = arith.truncf %50 : vector<4x8x8xf32> to vector<4x8x8xbf16>
    "tpu.trace_start"() <{level = 10 : i32, message = "hqd,hkd->hqk"}> : () -> ()
    %cst_24 = arith.constant dense<0.000000e+00> : vector<4x8x8xf32>
    %52 = tpu.matmul %47, %49, %cst_24 {dimension_numbers = #tpu.dot_dimension_numbers<[2], [2], [1], [1], [0, 0, 0, 1, 1, 1], [0], [0]>} : vector<4x8x8xbf16>, vector<4x8x8xbf16>, vector<4x8x8xf32> -> vector<4x8x8xf32>
    "tpu.trace_stop"() : () -> ()
    %cst_25 = arith.constant 0.353553385 : f32
    %53 = vector.broadcast %cst_25 : f32 to vector<4x8x8xf32>
    %54 = arith.mulf %52, %53 : vector<4x8x8xf32>
    %55 = vector.broadcast %10 : vector<1x1x8xf32> to vector<4x8x8xf32>
    %56 = arith.addf %54, %55 : vector<4x8x8xf32>
    %cst_26 = arith.constant dense<0xFF800000> : vector<4x8xf32>
    %57 = vector.multi_reduction <maximumf>, %56, %cst_26 [2] : vector<4x8x8xf32> to vector<4x8xf32>
    %58 = vector.shape_cast %57 : vector<4x8xf32> to vector<4x8x1xf32>
    %59 = vector.broadcast %58 : vector<4x8x1xf32> to vector<4x8x8xf32>
    %60 = arith.subf %56, %59 : vector<4x8x8xf32>
    %61 = math.exp %60 : vector<4x8x8xf32>
    %cst_27 = arith.constant dense<0.000000e+00> : vector<4x8xf32>
    %62 = vector.multi_reduction <add>, %61, %cst_27 [2] : vector<4x8x8xf32> to vector<4x8xf32>
    %63 = vector.shape_cast %62 : vector<4x8xf32> to vector<4x8x1xf32>
    %64 = tpu.reciprocal %63 {approx = true} : vector<4x8x1xf32> -> vector<4x8x1xf32>
    %65 = vector.broadcast %64 : vector<4x8x1xf32> to vector<4x8x8xf32>
    %66 = arith.mulf %61, %65 : vector<4x8x8xf32>
    %67 = arith.truncf %66 : vector<4x8x8xf32> to vector<4x8x8xbf16>
    "tpu.trace_start"() <{level = 10 : i32, message = "hqk,hkd->hqd"}> : () -> ()
    %cst_28 = arith.constant dense<0.000000e+00> : vector<4x8x8xf32>
    %68 = tpu.matmul %67, %51, %cst_28 {dimension_numbers = #tpu.dot_dimension_numbers<[2], [1], [1], [2], [0, 0, 0, 1, 1, 2], [0], [0]>} : vector<4x8x8xbf16>, vector<4x8x8xbf16>, vector<4x8x8xf32> -> vector<4x8x8xf32>
    "tpu.trace_stop"() : () -> ()
    %69 = arith.truncf %68 : vector<4x8x8xf32> to vector<4x8x8xbf16>
    %c0_29 = arith.constant 0 : index
    %c0_30 = arith.constant 0 : index
    %c0_31 = arith.constant 0 : index
    %c0_32 = arith.constant 0 : index
    %70 = vector.load %arg10[%c0_29, %c0_30, %c0_31, %c0_32] : memref<1x4x8x32xbf16, #tpu.memory_space<vmem>>, vector<1x4x8x32xbf16>
    %71 = vector.shape_cast %70 : vector<1x4x8x32xbf16> to vector<4x8x32xbf16>
    "tpu.trace_start"() <{level = 10 : i32, message = "hsd,hdm->hsm"}> : () -> ()
    %cst_33 = arith.constant dense<0.000000e+00> : vector<4x8x32xf32>
    %72 = tpu.matmul %69, %71, %cst_33 {dimension_numbers = #tpu.dot_dimension_numbers<[2], [1], [1], [2], [0, 0, 0, 1, 1, 2], [0], [0]>} : vector<4x8x8xbf16>, vector<4x8x32xbf16>, vector<4x8x32xf32> -> vector<4x8x32xf32>
    "tpu.trace_stop"() : () -> ()
    %cst_34 = arith.constant dense<0.000000e+00> : vector<8x32xf32>
    %73 = vector.multi_reduction <add>, %72, %cst_34 [0] : vector<4x8x32xf32> to vector<8x32xf32>
    %c0_35 = arith.constant 0 : index
    %c0_36 = arith.constant 0 : index
    %c0_37 = arith.constant 0 : index
    %74 = vector.load %arg11[%c0_35, %c0_36, %c0_37] : memref<1x1x32xf32, #tpu.memory_space<vmem>>, vector<1x1x32xf32>
    %75 = vector.shape_cast %74 : vector<1x1x32xf32> to vector<1x32xf32>
    %76 = vector.broadcast %75 : vector<1x32xf32> to vector<8x32xf32>
    %77 = arith.addf %73, %76 : vector<8x32xf32>
    %78 = arith.addf %3, %77 : vector<8x32xf32>
    %c0_38 = arith.constant 0 : index
    %c0_39 = arith.constant 0 : index
    %c0_40 = arith.constant 0 : index
    %79 = vector.load %arg6[%c0_38, %c0_39, %c0_40] : memref<1x1x32xf32, #tpu.memory_space<vmem>>, vector<1x1x32xf32>
    %80 = vector.shape_cast %79 : vector<1x1x32xf32> to vector<1x32xf32>
    %c0_41 = arith.constant 0 : index
    %c0_42 = arith.constant 0 : index
    %c0_43 = arith.constant 0 : index
    %81 = vector.load %arg7[%c0_41, %c0_42, %c0_43] : memref<1x1x32xf32, #tpu.memory_space<vmem>>, vector<1x1x32xf32>
    %82 = vector.shape_cast %81 : vector<1x1x32xf32> to vector<1x32xf32>
    %cst_44 = arith.constant dense<0.000000e+00> : vector<8xf32>
    %83 = vector.multi_reduction <add>, %78, %cst_44 [1] : vector<8x32xf32> to vector<8xf32>
    %84 = vector.shape_cast %83 : vector<8xf32> to vector<8x1xf32>
    %cst_45 = arith.constant 3.200000e+01 : f32
    %85 = vector.broadcast %cst_45 : f32 to vector<8x1xf32>
    %86 = arith.divf %84, %85 : vector<8x1xf32>
    %87 = vector.broadcast %86 : vector<8x1xf32> to vector<8x32xf32>
    %88 = arith.subf %78, %87 : vector<8x32xf32>
    %89 = arith.mulf %88, %88 : vector<8x32xf32>
    %cst_46 = arith.constant dense<0.000000e+00> : vector<8xf32>
    %90 = vector.multi_reduction <add>, %89, %cst_46 [1] : vector<8x32xf32> to vector<8xf32>
    %91 = vector.shape_cast %90 : vector<8xf32> to vector<8x1xf32>
    %cst_47 = arith.constant 3.100000e+01 : f32
    %92 = vector.broadcast %cst_47 : f32 to vector<8x1xf32>
    %93 = arith.divf %91, %92 : vector<8x1xf32>
    %94 = math.sqrt %93 : vector<8x1xf32>
    %cst_48 = arith.constant 9.99999997E-7 : f32
    %95 = vector.broadcast %cst_48 : f32 to vector<8x1xf32>
    %96 = arith.addf %94, %95 : vector<8x1xf32>
    %97 = tpu.reciprocal %96 {approx = true} : vector<8x1xf32> -> vector<8x1xf32>
    %98 = vector.broadcast %80 : vector<1x32xf32> to vector<8x32xf32>
    %99 = arith.mulf %98, %88 : vector<8x32xf32>
    %100 = vector.broadcast %97 : vector<8x1xf32> to vector<8x32xf32>
    %101 = arith.mulf %99, %100 : vector<8x32xf32>
    %102 = vector.broadcast %82 : vector<1x32xf32> to vector<8x32xf32>
    %103 = arith.addf %101, %102 : vector<8x32xf32>
    %104 = arith.truncf %103 : vector<8x32xf32> to vector<8x32xbf16>
    %c0_49 = arith.constant 0 : index
    %c0_50 = arith.constant 0 : index
    %c0_51 = arith.constant 0 : index
    %105 = vector.load %arg12[%c0_49, %c0_50, %c0_51] : memref<1x32x64xbf16, #tpu.memory_space<vmem>>, vector<1x32x64xbf16>
    %106 = vector.shape_cast %105 : vector<1x32x64xbf16> to vector<32x64xbf16>
    %cst_52 = arith.constant dense<0.000000e+00> : vector<8x64xf32>
    %107 = tpu.matmul %104, %106, %cst_52 {dimension_numbers = #tpu.dot_dimension_numbers<[1], [0], [0], [1], [0, 0, 1, 1], [], []>} : vector<8x32xbf16>, vector<32x64xbf16>, vector<8x64xf32> -> vector<8x64xf32>
    %c0_53 = arith.constant 0 : index
    %c0_54 = arith.constant 0 : index
    %c0_55 = arith.constant 0 : index
    %108 = vector.load %arg13[%c0_53, %c0_54, %c0_55] : memref<1x1x64xf32, #tpu.memory_space<vmem>>, vector<1x1x64xf32>
    %109 = vector.shape_cast %108 : vector<1x1x64xf32> to vector<1x64xf32>
    %110 = vector.broadcast %109 : vector<1x64xf32> to vector<8x64xf32>
    %111 = arith.addf %107, %110 : vector<8x64xf32>
    %cst_56 = arith.constant 0.000000e+00 : f32
    %112 = vector.broadcast %cst_56 : f32 to vector<8x64xf32>
    %113 = arith.maximumf %111, %112 : vector<8x64xf32>
    %114 = arith.truncf %113 : vector<8x64xf32> to vector<8x64xbf16>
    %c0_57 = arith.constant 0 : index
    %c0_58 = arith.constant 0 : index
    %c0_59 = arith.constant 0 : index
    %115 = vector.load %arg14[%c0_57, %c0_58, %c0_59] : memref<1x64x32xbf16, #tpu.memory_space<vmem>>, vector<1x64x32xbf16>
    %116 = vector.shape_cast %115 : vector<1x64x32xbf16> to vector<64x32xbf16>
    %cst_60 = arith.constant dense<0.000000e+00> : vector<8x32xf32>
    %117 = tpu.matmul %114, %116, %cst_60 {dimension_numbers = #tpu.dot_dimension_numbers<[1], [0], [0], [1], [0, 0, 1, 1], [], []>} : vector<8x64xbf16>, vector<64x32xbf16>, vector<8x32xf32> -> vector<8x32xf32>
    %c0_61 = arith.constant 0 : index
    %c0_62 = arith.constant 0 : index
    %c0_63 = arith.constant 0 : index
    %118 = vector.load %arg15[%c0_61, %c0_62, %c0_63] : memref<1x1x32xf32, #tpu.memory_space<vmem>>, vector<1x1x32xf32>
    %119 = vector.shape_cast %118 : vector<1x1x32xf32> to vector<1x32xf32>
    %120 = vector.broadcast %119 : vector<1x32xf32> to vector<8x32xf32>
    %121 = arith.addf %117, %120 : vector<8x32xf32>
    %122 = arith.addf %78, %121 : vector<8x32xf32>
    %c0_64 = arith.constant 0 : index
    %c0_65 = arith.constant 0 : index
    %123 = vector.load %arg19[%c0_64, %c0_65] : memref<8x32xf32, #tpu.memory_space<vmem>>, vector<8x32xf32>
    tpu.vector_store %arg19[%c0_64, %c0_65], %122 {strides = array<i32>} : memref<8x32xf32, #tpu.memory_space<vmem>>, vector<8x32xf32>,
    %c1_i32 = arith.constant 1 : i32
    %124 = arith.cmpi eq, %arg1, %c1_i32 : i32
    %125 = arith.extui %124 : i1 to i32
    %c0_i32_66 = arith.constant 0 : i32
    %126 = arith.cmpi ne, %125, %c0_i32_66 : i32
    scf.if %126 {
      %c0_67 = arith.constant 0 : index
      %c0_68 = arith.constant 0 : index
      %127 = vector.load %arg16[%c0_67, %c0_68] : memref<1x32xf32, #tpu.memory_space<vmem>>, vector<1x32xf32>
      %128 = vector.shape_cast %127 : vector<1x32xf32> to vector<32xf32>
      %c0_69 = arith.constant 0 : index
      %c0_70 = arith.constant 0 : index
      %129 = vector.load %arg17[%c0_69, %c0_70] : memref<1x32xf32, #tpu.memory_space<vmem>>, vector<1x32xf32>
      %130 = vector.shape_cast %129 : vector<1x32xf32> to vector<32xf32>
      %cst_71 = arith.constant dense<0.000000e+00> : vector<8xf32>
      %131 = vector.multi_reduction <add>, %122, %cst_71 [1] : vector<8x32xf32> to vector<8xf32>
      %132 = vector.shape_cast %131 : vector<8xf32> to vector<8x1xf32>
      %cst_72 = arith.constant 3.200000e+01 : f32
      %133 = vector.broadcast %cst_72 : f32 to vector<8x1xf32>
      %134 = arith.divf %132, %133 : vector<8x1xf32>
      %135 = vector.broadcast %134 : vector<8x1xf32> to vector<8x32xf32>
      %136 = arith.subf %122, %135 : vector<8x32xf32>
      %137 = arith.mulf %136, %136 : vector<8x32xf32>
      %cst_73 = arith.constant dense<0.000000e+00> : vector<8xf32>
      %138 = vector.multi_reduction <add>, %137, %cst_73 [1] : vector<8x32xf32> to vector<8xf32>
      %139 = vector.shape_cast %138 : vector<8xf32> to vector<8x1xf32>
      %cst_74 = arith.constant 3.100000e+01 : f32
      %140 = vector.broadcast %cst_74 : f32 to vector<8x1xf32>
      %141 = arith.divf %139, %140 : vector<8x1xf32>
      %142 = math.sqrt %141 : vector<8x1xf32>
      %cst_75 = arith.constant 9.99999997E-7 : f32
      %143 = vector.broadcast %cst_75 : f32 to vector<8x1xf32>
      %144 = arith.addf %142, %143 : vector<8x1xf32>
      %145 = tpu.reciprocal %144 {approx = true} : vector<8x1xf32> -> vector<8x1xf32>
      %146 = vector.shape_cast %128 : vector<32xf32> to vector<1x32xf32>
      %147 = vector.broadcast %146 : vector<1x32xf32> to vector<8x32xf32>
      %148 = arith.mulf %147, %136 : vector<8x32xf32>
      %149 = vector.broadcast %145 : vector<8x1xf32> to vector<8x32xf32>
      %150 = arith.mulf %148, %149 : vector<8x32xf32>
      %151 = vector.shape_cast %130 : vector<32xf32> to vector<1x32xf32>
      %152 = vector.broadcast %151 : vector<1x32xf32> to vector<8x32xf32>
      %153 = arith.addf %150, %152 : vector<8x32xf32>
      %c0_76 = arith.constant 0 : index
      %c0_77 = arith.constant 0 : index
      %c0_78 = arith.constant 0 : index
      %154 = vector.load %arg18[%c0_76, %c0_77, %c0_78] : memref<1x8x32xf32, #tpu.memory_space<vmem>>, vector<1x8x32xf32>
      %155 = vector.shape_cast %154 : vector<1x8x32xf32> to vector<8x32xf32>
      %156 = vector.shape_cast %153 : vector<8x32xf32> to vector<1x8x32xf32>
      tpu.vector_store %arg18[%c0_76, %c0_77, %c0_78], %156 {strides = array<i32>} : memref<1x8x32xf32, #tpu.memory_space<vmem>>, vector<1x8x32xf32>,
    } else {
    }
    return
  }
  func.func @transform_0(%arg0: i32, %arg1: i32) -> (i32, i32, i32) {
    %c0_i32 = arith.constant 0 : i32
    %c0_i32_0 = arith.constant 0 : i32
    %c0_i32_1 = arith.constant 0 : i32
    return %arg0, %c0_i32, %c0_i32_0 : i32, i32, i32
  }
  func.func @transform_1(%arg0: i32, %arg1: i32) -> (i32, i32, i32) {
    %c0_i32 = arith.constant 0 : i32
    %c0_i32_0 = arith.constant 0 : i32
    %c0_i32_1 = arith.constant 0 : i32
    return %arg0, %c0_i32, %c0_i32_0 : i32, i32, i32
  }
  func.func @transform_2(%arg0: i32, %arg1: i32) -> (i32, i32, i32) {
    %c0_i32 = arith.constant 0 : i32
    %c0_i32_0 = arith.constant 0 : i32
    %c0_i32_1 = arith.constant 0 : i32
    return %arg1, %c0_i32, %c0_i32_0 : i32, i32, i32
  }
  func.func @transform_3(%arg0: i32, %arg1: i32) -> (i32, i32, i32) {
    %c0_i32 = arith.constant 0 : i32
    %c0_i32_0 = arith.constant 0 : i32
    %c0_i32_1 = arith.constant 0 : i32
    return %arg1, %c0_i32, %c0_i32_0 : i32, i32, i32
  }
  func.func @transform_4(%arg0: i32, %arg1: i32) -> (i32, i32, i32) {
    %c0_i32 = arith.constant 0 : i32
    %c0_i32_0 = arith.constant 0 : i32
    %c0_i32_1 = arith.constant 0 : i32
    return %arg1, %c0_i32, %c0_i32_0 : i32, i32, i32
  }
  func.func @transform_5(%arg0: i32, %arg1: i32) -> (i32, i32, i32) {
    %c0_i32 = arith.constant 0 : i32
    %c0_i32_0 = arith.constant 0 : i32
    %c0_i32_1 = arith.constant 0 : i32
    return %arg1, %c0_i32, %c0_i32_0 : i32, i32, i32
  }
  func.func @transform_6(%arg0: i32, %arg1: i32) -> (i32, i32, i32) {
    %c0_i32 = arith.constant 0 : i32
    %c0_i32_0 = arith.constant 0 : i32
    %c0_i32_1 = arith.constant 0 : i32
    return %arg1, %c0_i32, %c0_i32_0 : i32, i32, i32
  }
  func.func @transform_7(%arg0: i32, %arg1: i32) -> (i32, i32, i32) {
    %c0_i32 = arith.constant 0 : i32
    %c0_i32_0 = arith.constant 0 : i32
    %c0_i32_1 = arith.constant 0 : i32
    return %arg1, %c0_i32, %c0_i32_0 : i32, i32, i32
  }
  func.func @transform_8(%arg0: i32, %arg1: i32) -> (i32, i32, i32, i32) {
    %c0_i32 = arith.constant 0 : i32
    %c0_i32_0 = arith.constant 0 : i32
    %c0_i32_1 = arith.constant 0 : i32
    %c0_i32_2 = arith.constant 0 : i32
    return %arg1, %c0_i32, %c0_i32_0, %c0_i32_1 : i32, i32, i32, i32
  }
  func.func @transform_9(%arg0: i32, %arg1: i32) -> (i32, i32, i32) {
    %c0_i32 = arith.constant 0 : i32
    %c0_i32_0 = arith.constant 0 : i32
    %c0_i32_1 = arith.constant 0 : i32
    return %arg1, %c0_i32, %c0_i32_0 : i32, i32, i32
  }
  func.func @transform_10(%arg0: i32, %arg1: i32) -> (i32, i32, i32) {
    %c0_i32 = arith.constant 0 : i32
    %c0_i32_0 = arith.constant 0 : i32
    %c0_i32_1 = arith.constant 0 : i32
    return %arg1, %c0_i32, %c0_i32_0 : i32, i32, i32
  }
  func.func @transform_11(%arg0: i32, %arg1: i32) -> (i32, i32, i32) {
    %c0_i32 = arith.constant 0 : i32
    %c0_i32_0 = arith.constant 0 : i32
    %c0_i32_1 = arith.constant 0 : i32
    return %arg1, %c0_i32, %c0_i32_0 : i32, i32, i32
  }
  func.func @transform_12(%arg0: i32, %arg1: i32) -> (i32, i32, i32) {
    %c0_i32 = arith.constant 0 : i32
    %c0_i32_0 = arith.constant 0 : i32
    %c0_i32_1 = arith.constant 0 : i32
    return %arg1, %c0_i32, %c0_i32_0 : i32, i32, i32
  }
  func.func @transform_13(%arg0: i32, %arg1: i32) -> (i32, i32, i32) {
    %c0_i32 = arith.constant 0 : i32
    %c0_i32_0 = arith.constant 0 : i32
    %c0_i32_1 = arith.constant 0 : i32
    return %arg1, %c0_i32, %c0_i32_0 : i32, i32, i32
  }
  func.func @transform_14(%arg0: i32, %arg1: i32) -> (i32, i32) {
    %c0_i32 = arith.constant 0 : i32
    %c0_i32_0 = arith.constant 0 : i32
    %c0_i32_1 = arith.constant 0 : i32
    return %c0_i32, %c0_i32_0 : i32, i32
  }
  func.func @transform_15(%arg0: i32, %arg1: i32) -> (i32, i32) {
    %c0_i32 = arith.constant 0 : i32
    %c0_i32_0 = arith.constant 0 : i32
    %c0_i32_1 = arith.constant 0 : i32
    return %c0_i32, %c0_i32_0 : i32, i32
  }
  func.func @transform_16(%arg0: i32, %arg1: i32) -> (i32, i32, i32) {
    %c0_i32 = arith.constant 0 : i32
    %c0_i32_0 = arith.constant 0 : i32
    %c0_i32_1 = arith.constant 0 : i32
    return %arg0, %c0_i32, %c0_i32_0 : i32, i32, i32
  }
}

</mosaic_0001>

<bundles_post_ra>
// kernel: tpu_custom_call.1
= control target key start
LH: loop header
LB: loop body
LE: loop exit
PB: predicated region body
PF: predicated region fallthrough
CT: control target
= control target key end

     0   :  { %s3815_s0 = inlined_call_operand.hbm [shape: f32[2,8,32], index: 0, kind: input, shape index: {}]   ;;  %s3816_s1 = inlined_call_operand.vmem [shape: f32[2,1,8], index: 1, kind: input, shape index: {}]   ;;  %s3817_s2 = inlined_call_operand.vmem [shape: f32[2,1,32], index: 2, kind: input, shape index: {}]   ;;  %s3818_s3 = inlined_call_operand.vmem [shape: f32[2,1,32], index: 3, kind: input, shape index: {}]   ;;  %s3819_s4 = inlined_call_operand.vmem [shape: f32[2,1,32], index: 4, kind: input, shape index: {}]   ;;  %s3820_s5 = inlined_call_operand.vmem [shape: f32[2,1,32], index: 5, kind: input, shape index: {}]   ;;  %s3821_s6 = inlined_call_operand.vmem [shape: bf16[2,32,96], index: 6, kind: input, shape index: {}]   ;;  %s3822_s7 = inlined_call_operand.vmem [shape: f32[2,1,96], index: 7, kind: input, shape index: {}]   ;;  %s3823_s8 = inlined_call_operand.vmem [shape: bf16[2,4,8,32], index: 8, kind: input, shape index: {}]   ;;  %s3824_s9 = inlined_call_operand.hbm [shape: f32[2,1,32], index: 9, kind: input, shape index: {}]   ;;  %s3825_s10 = inlined_call_operand.vmem [shape: bf16[2,32,64], index: 10, kind: input, shape index: {}]   ;;  %s3826_s11 = inlined_call_operand.hbm [shape: f32[2,1,64], index: 11, kind: input, shape index: {}]   ;;  %s3827_s12 = inlined_call_operand.vmem [shape: bf16[2,64,32], index: 12, kind: input, shape index: {}]   ;;  %s3828_s13 = inlined_call_operand.vmem [shape: f32[2,1,32], index: 13, kind: input, shape index: {}]   ;;  %s3829_s14 = inlined_call_operand.vmem [shape: f32[1,32], index: 14, kind: input, shape index: {}]   ;;  %s3830_s15 = inlined_call_operand.vmem [shape: f32[1,32], index: 15, kind: input, shape index: {}]   ;;  %s3831_s16 = inlined_call_operand.hbm [shape: f32[2,8,32], index: 16, kind: output, shape index: {}]  }
   0x1   :  { %3858 = sst [smem:[#allocation27_spill]] %s3815_s0 }
   0x2   :  { %3859 = sst [smem:[#allocation28_spill]] %s3816_s1 }
   0x3   :  { %3860 = sst [smem:[#allocation29_spill]] %s3817_s2 }
   0x4   :  { %3861 = sst [smem:[#allocation30_spill]] %s3818_s3 }
   0x5   :  { %3862 = sst [smem:[#allocation31_spill]] %s3819_s4 }
   0x6   :  { %3863 = sst [smem:[#allocation32_spill]] %s3820_s5 }
   0x7   :  { %3864 = sst [smem:[#allocation33_spill]] %s3821_s6 }
   0x8   :  { %3865 = sst [smem:[#allocation34_spill]] %s3822_s7 }
   0x9   :  { %3866 = sst [smem:[#allocation35_spill]] %s3823_s8 }
   0xa   :  { %3867 = sst [smem:[#allocation36_spill]] %s3824_s9 }
   0xb   :  { %3868 = sst [smem:[#allocation37_spill]] %s3825_s10 }
   0xc   :  { %3869 = sst [smem:[#allocation38_spill]] %s3826_s11 }
   0xd   :  { %3870 = sst [smem:[#allocation39_spill]] %s3827_s12 }
   0xe   :  { %3871 = sst [smem:[#allocation40_spill]] %s3828_s13 }
   0xf   :  { %3872 = sst [smem:[#allocation41_spill]] %s3829_s14 }
  0x10   :  { %3873 = sst [smem:[#allocation42_spill]] %s3830_s15 }
  0x11   :  { %3874 = sst [smem:[#allocation43_spill]] %s3831_s16 }
  0x12   :  { %21 = vsyncpa [#allocation4], 0 }
  0x13   :  { %23 = vsyncpa [#allocation4 + $0x1], 0 }
  0x14   :  { %24 = vsyncpa [#allocation7], 0 }
  0x15   :  { %26 = vsyncpa [#allocation7 + $0x1], 0 }
  0x16   :  { %27 = vsyncpa [#allocation5], 0 }
  0x17   :  { %29 = vsyncpa [#allocation5 + $0x1], 0  ;;  %s3171_s21 = smov 0   ;;  %s3173_s22 = smov 0  }
  0x18   :  { %s3175_s23 = smov 0   ;;  %s3177_s24 = smov 0  }
  0x19   :  { %s3179_s25 = smov 0   ;;  %s3181_s26 = smov 0  }
  0x1a   :  { %s3183_s27 = smov 0   ;;  %s3185_s28 = smov 0  }
  0x1b   :  { %s3187_s29 = smov 0   ;;  %s3189_s30 = smov 0  }
  0x1c   :  { %s3191_s0 = smov 0  }
  0x1d LB: > { %3875 = sst [smem:[#allocation13_spill]] %s3029_s22  ;;  %s3225_s17 = sadd.s32 4294967295, %s3065_s0   ;;  %s3065_s0 = sphi %s3191_s0, %s35_s0   ;;  %s3061_s30 = sphi %s3189_s30, %s3953_s30   ;;  %s3057_s29 = sphi %s3187_s29, %s3952_s29   ;;  %s3053_s28 = sphi %s3185_s28, %s3951_s28   ;;  %s3049_s27 = sphi %s3183_s27, %s3950_s27   ;;  %s3045_s26 = sphi %s3181_s26, %s3949_s26   ;;  %s3041_s25 = sphi %s3179_s25, %s3948_s25   ;;  %s3037_s24 = sphi %s3177_s24, %s3947_s24   ;;  %s3033_s23 = sphi %s3175_s23, %s3946_s23   ;;  %s3029_s22 = sphi %s3173_s22, %s3945_s22   ;;  %s3025_s21 = sphi %s3171_s21, %s3944_s21  }
  0x1e   : > { %3876 = sst [smem:[#allocation14_spill]] %s3033_s23  ;;  %s44_s18 = sadd.s32 1, %s3057_s29 }
  0x1f   : > { %3877 = sst [smem:[#allocation15_spill]] %s3037_s24  ;;  %p3228_p0 = scmp.ge.s32.totalorder %s44_s18, 2 }
  0x20   : > { %3878 = sst [smem:[#allocation16_spill]] %s3041_s25  ;;  %p3839_p1 = scmp.eq.s32.totalorder %s3065_s0, 0 }
  0x21   : > { %3879 = sst [smem:[#allocation17_spill]] %s3045_s26  ;;  %p3838_p2 = scmp.eq.s32.totalorder %s3225_s17, 0 }
  0x22   : > { %3880 = sst [smem:[#allocation18_spill]] %s3057_s29  ;;  %s288_s20 = sadd.s32 1, %s3033_s23 }
  0x23   : > { %3881 = sst [smem:[#allocation19_spill]] %s3061_s30  ;;  %s3955_s18 = smov (%p3228_p0, %s44_s18), 0 }
  0x24   : > { %3882 = sst [smem:[#allocation20_spill]] %s3065_s0  ;;  %p295_p3 = scmp.ne.s32.totalorder %s3033_s23, %s3029_s22 }
  0x25   : > { %3884 = sst [smem:[#allocation21_spill]] %s3955_s18  ;;  %p301_p4 = scmp.ne.s32.totalorder %s3029_s22, %s3025_s21 }
  0x26   : > { %s285_s16 = ssub.s32 %s3057_s29, %s3955_s18  ;;  %p297_p6 = por %p295_p3, %p3839_p1 }
  0x27   : > { %p286_p5 = scmp.eq.s32.totalorder %s285_s16, 0  ;;  %p3248_p7 = por %p301_p4, %p3838_p2 }
  0x28   : > { %p3837_p8 = scmp.lt.s32.totalorder %s3065_s0, 4  ;;  %s573_s13 = sand.u32 1, %s3065_s0  }
  0x29   : > { %s3885_s15 = scalar_select %p3248_p7, 1, 0 }
  0x2a   : > { %s3254_s14 = scalar_select %p286_p5, %s3033_s23, %s288_s20  }
  0x2b   : > { %s3835_s12 = sand.u32 1, %s3033_s23   ;;  %s3836_s10 = sshll.u32 %s3057_s29, 4 }
  0x2c   : > { %3886 = sst [smem:[#allocation22_spill]] %s3254_s14  ;;  %s576_s8 = scalar_lea.vmem [#allocation6], %s3835_s12 }
  0x2d   : > { %s583_s6 = sshll.u32 %s576_s8, 4  ;;  %s3887_s9 = sld [smem:[#allocation36_spill]]  ;;  %s3268_s6 = int_to_ptr.vmem [resolvable:$true] %s583_s6 }
  0x2e   : > { %p3272_p9 = pnand %p3837_p8, %p297_p6  ;;  %s3278_s8 = scalar_lea.sflag [#allocation7], %s573_s13 }
  0x30   : > { %p3846_p13 = pneg %p3272_p9 }
  0x33   : > { %s3266_s16 = scalar_lea.hbm %s3887_s9, %s3836_s10  ;;  %s2854_s10 = scalar_lea.hbm %s3887_s9, 32 }
  0x34   : > { %s2849_s18 = scalar_lea.hbm %s3266_s16, 16  ;;  %p2855_p5 = scmp.lt.u32.totalorder %s3266_s16, %s3887_s9 }
  0x35   : > { %p2850_p12 = scmp.ne.s32.totalorder %s3266_s16, %s2849_s18  ;;  %p2856_p6 = scmp.lt.u32.totalorder %s2854_s10, %s2849_s18 }
  0x36   : > { %p2858_p2 = scmp.lt.u32.totalorder %s2849_s18, %s3266_s16 }
  0x37   : > { %p2852_p3 = pnand %p3846_p13, %p2850_p12  ;;  %p2857_p8 = por %p2856_p6, %p2855_p5 }
  0x39   : > { %p2853_p4 = pneg %p2852_p3  ;;  %p2859_p1 = por %p2858_p2, %p2857_p8 }
  0x3b   : > { %p2860_p10 = pnand %p2859_p1, %p2853_p4 }
  0x3d   : > { %2863 = shalt.err (!%p2860_p10)
}
  0x3e   : > { %s2864_s13 = scalar_lea.vmem %s3268_s6, 16  ;;  %s3067_s12 = smov [#allocation6]  }
  0x3f   : > { %p2865_p12 = scmp.ne.s32.totalorder %s3268_s6, %s2864_s13  ;;  %s2869_s21 = sshll.u32 %s3067_s12, 4  ;;  %s2870_s21 = int_to_ptr.vmem [resolvable:$false] %s2869_s21 }
  0x40   : > { %s2871_s7 = scalar_lea.vmem %s2870_s21, 32  ;;  %p2872_p7 = scmp.lt.s32.totalorder %s3268_s6, %s2870_s21 }
  0x41   : > { %p2867_p3 = pnand %p2865_p12, %p3846_p13  ;;  %p2873_p5 = scmp.lt.s32.totalorder %s2871_s7, %s2864_s13 }
  0x43   : > { %p2868_p11 = pneg %p2867_p3  ;;  %p2874_p6 = por %p2873_p5, %p2872_p7 }
  0x45   : > { %p2875_p2 = pnand %p2874_p6, %p2868_p11 }
  0x47   : > { %2878 = shalt.err (!%p2875_p2)
}
  0x48   : > { %2700 = dma.hbm_to_vmem [thread:$0]  (!%p3272_p9), %s3266_s16, 16, %s3268_s6, %s3278_s8  }
  0x49   : > { %p3889_p1 = scmp.lt.s32.totalorder %s3065_s0, 5  ;;  %p3890_p7 = scmp.ge.s32.totalorder %s3065_s0, 1 }
  0x4a   : > { %s2479_s14 = sadd.s32 4294967294, %s3065_s0   ;;  %s47_s18 = sadd.s32 1, %s3061_s30 }
  0x4b   : > { %p3310_p8 = pnand %p3890_p7, %p3889_p1  ;;  %s54_s13 = sadd.s32 1, %s3045_s26 }
  0x4c   : > { %s3957_s18 = smov (!%p3228_p0, %s47_s18), %s3061_s30  ;;  %p61_p10 = scmp.ne.s32.totalorder %s3045_s26, %s3041_s25 }
  0x4d   : > { %s3891_s10 = scalar_select %p3310_p8, 1, 0 }
  0x4e   : > { %p67_p11 = scmp.ne.s32.totalorder %s3041_s25, %s3037_s24  ;;  %p49_p4 = scmp.ge.s32.totalorder %s3957_s18, 2 }
  0x4f   : > { %p471_p12 = scmp.eq.s32.totalorder %s3225_s17, 3  ;;  %p3892_p3 = scmp.eq.s32.totalorder %s3065_s0, 0 }
  0x50   : > { %p3894_p6 = scmp.eq.s32.totalorder %s3225_s17, 0  ;;  %s3959_s18 = smov (%p49_p4, %s3957_s18), 0 }
  0x51   : > { %p3327_p5 = por %p3892_p3, %p61_p10  ;;  %3896 = sst [smem:[#allocation23_spill]] %s3959_s18 }
  0x52   : > { %p3333_p2 = por %p3894_p6, %p67_p11  ;;  %p3339_p0 = por %p471_p12, %p61_p10 }
  0x53   : > { %p477_p1 = scmp.eq.s32.totalorder %s2479_s14, 3  ;;  %s51_s12 = ssub.s32 %s3061_s30, %s3959_s18 }
  0x54   : > { %s3895_s16 = scalar_select %p3333_p2, 1, 0 }
  0x55   : > { %s3897_s19 = scalar_select %p3339_p0, 1, 0 }
  0x56   : > { %s503_s21 = sand.u32 1, %s3045_s26   ;;  %p52_p7 = scmp.eq.s32.totalorder %s51_s12, 0 }
  0x57   : > { %3898 = sst [smem:[#allocation24_spill]] %s3897_s19  ;;  %p3346_p3 = por %p477_p1, %p67_p11 }
  0x58   : > { %s2482_s9 = sshll.u32 %s503_s21, 3  ;;  %s2483_s5 = sshll.u32 %s3061_s30, 7 }
  0x59   : > { %s3899_s7 = scalar_select %p3346_p3, 1, 0 }
  0x5a   : > { %s3351_s24 = scalar_select %p52_p7, %s3045_s26, %s54_s13  }
  0x5b   : > { %3900 = sst [smem:[#allocation25_spill]] %s3899_s7  ;;  %s3902_s2 = sld [smem:[#allocation27_spill]] }
  0x5c   : > { %3901 = sst [smem:[#allocation26_spill]] %s3351_s24  ;;  %s507_s14 = scalar_lea.vmem [#allocation3], %s2482_s9 }
  0x5d   : > { %s514_s18 = sshll.u32 %s507_s14, 4  ;;  %p3903_p10 = scmp.lt.s32.totalorder %s3065_s0, 4  ;;  %s3359_s18 = int_to_ptr.vmem [resolvable:$true] %s514_s18 }
  0x5e   : > { %s3905_s13 = sshll.u32 %s3057_s29, 4  ;;  %s3906_s11 = sld [smem:[#allocation38_spill]] }
  0x5f   : > { %p3365_p11 = pnand %p3903_p10, %p3327_p5  ;;  %s3907_s4 = sand.u32 1, %s3033_s23  }
  0x60   : > { %s504_s6 = scalar_lea.sflag [#allocation4], %s503_s21 }
  0x61   : > { %s3357_s1 = scalar_lea.hbm %s3902_s2, %s2483_s5  ;;  %s601_s5 = scalar_lea.vmem [#allocation8], %s3907_s4 }
  0x62   : > { %s608_s9 = sshll.u32 %s601_s5, 4  ;;  %s2879_s14 = scalar_lea.hbm %s3357_s1, 128  ;;  %s3378_s9 = int_to_ptr.vmem [resolvable:$true] %s608_s9 }
  0x63   : > { %p2880_p4 = scmp.ne.s32.totalorder %s3357_s1, %s2879_s14  ;;  %p2881_p12 = pneg %p3365_p11 }
  0x64   : > { %s3374_s3 = scalar_lea.hbm %s3906_s11, %s3905_s13  ;;  %s2884_s30 = scalar_lea.hbm %s3902_s2, 256 }
  0x65   : > { %p2882_p5 = pnand %p2881_p12, %p2880_p4  ;;  %p2885_p1 = scmp.lt.u32.totalorder %s3357_s1, %s3902_s2 }
  0x66   : > { %p2886_p7 = scmp.lt.u32.totalorder %s2884_s30, %s2879_s14  ;;  %p2888_p13 = scmp.lt.u32.totalorder %s2879_s14, %s3357_s1 }
  0x67   : > { %p2883_p6 = pneg %p2882_p5 }
  0x68   : > { %p2887_p10 = por %p2886_p7, %p2885_p1 }
  0x6a   : > { %p2889_p3 = por %p2888_p13, %p2887_p10 }
  0x6c   : > { %p2890_p0 = pnand %p2889_p3, %p2883_p6 }
  0x6e   : > { %2893 = shalt.err (!%p2890_p0)
}
  0x6f   : > { %s2894_s21 = scalar_lea.vmem %s3359_s18, 128  ;;  %s3068_s29 = smov [#allocation3]  }
  0x70   : > { %p2895_p4 = scmp.ne.s32.totalorder %s3359_s18, %s2894_s21  ;;  %s2899_s4 = sshll.u32 %s3068_s29, 4  ;;  %s2900_s4 = int_to_ptr.vmem [resolvable:$false] %s2899_s4 }
  0x71   : > { %s2901_s26 = scalar_lea.vmem %s2900_s4, 256  ;;  %p2902_p8 = scmp.lt.s32.totalorder %s3359_s18, %s2900_s4 }
  0x72   : > { %p2897_p5 = pnand %p2895_p4, %p2881_p12  ;;  %p2903_p1 = scmp.lt.s32.totalorder %s2901_s26, %s2894_s21 }
  0x74   : > { %p2898_p2 = pneg %p2897_p5  ;;  %p2904_p7 = por %p2903_p1, %p2902_p8 }
  0x76   : > { %p2905_p13 = pnand %p2904_p7, %p2898_p2 }
  0x78   : > { %2908 = shalt.err (!%p2905_p13)
}
  0x79   : > { %2697 = dma.hbm_to_vmem [thread:$0]  (!%p3365_p11), %s3357_s1, 128, %s3359_s18, %s504_s6  }
  0x7a   : > { %s2909_s5 = scalar_lea.hbm %s3374_s3, 16  ;;  %p3908_p3 = pneg %p3272_p9 }
  0x7b   : > { %p2910_p0 = scmp.ne.s32.totalorder %s3374_s3, %s2909_s5  ;;  %s2914_s30 = scalar_lea.hbm %s3906_s11, 32 }
  0x7c   : > { %p2915_p8 = scmp.lt.u32.totalorder %s3374_s3, %s3906_s11  ;;  %p2916_p2 = scmp.lt.u32.totalorder %s2914_s30, %s2909_s5 }
  0x7d   : > { %p2912_p12 = pnand %p2910_p0, %p3908_p3  ;;  %p2918_p4 = scmp.lt.u32.totalorder %s2909_s5, %s3374_s3 }
  0x7e   : > { %p2917_p10 = por %p2916_p2, %p2915_p8 }
  0x7f   : > { %p2913_p6 = pneg %p2912_p12 }
  0x80   : > { %p2919_p5 = por %p2918_p4, %p2917_p10 }
  0x82   : > { %p2920_p1 = pnand %p2919_p5, %p2913_p6 }
  0x84   : > { %2923 = shalt.err (!%p2920_p1)
}
  0x85   : > { %s2924_s1 = scalar_lea.vmem %s3378_s9, 16  ;;  %p3909_p7 = pmov %p3908_p3 }
  0x86   : > { %p2925_p11 = scmp.ne.s32.totalorder %s3378_s9, %s2924_s1  ;;  %s3069_s18 = smov [#allocation8]  }
  0x87   : > { %s2929_s6 = sshll.u32 %s3069_s18, 4  ;;  %s2930_s6 = int_to_ptr.vmem [resolvable:$false] %s2929_s6 }
  0x88   : > { %p2927_p13 = pnand %p2925_p11, %p3909_p7  ;;  %s2931_s21 = scalar_lea.vmem %s2930_s6, 32 }
  0x89   : > { %p2932_p3 = scmp.lt.s32.totalorder %s3378_s9, %s2930_s6  ;;  %p2933_p12 = scmp.lt.s32.totalorder %s2931_s21, %s2924_s1 }
  0x8a   : > { %p2928_p0 = pneg %p2927_p13 }
  0x8b   : > { %p2934_p8 = por %p2933_p12, %p2932_p3 }
  0x8d   : > { %p2935_p2 = pnand %p2934_p8, %p2928_p0 }
  0x8f   : > { %2938 = shalt.err (!%p2935_p2)
}
  0x90   : > { %2703 = dma.hbm_to_vmem [thread:$0]  (!%p3272_p9), %s3374_s3, 16, %s3378_s9, %s3278_s8  }
  0x91   : > { %p3910_p6 = scmp.ne.s32.totalorder %s3891_s10, 0 }
  0x92   : > { %s3432_s29 = sand.u32 (!%p3910_p6), 1, %s3041_s25   ;;  %p3911_p10 = scmp.ne.s32.totalorder (!%p3910_p6), %s3895_s16, 0 }
  0x93   : > { %631 = sbr.rel (%p3910_p6) target bundleno = 3016 (0xbc8), region = 84  ;;  %s2487_s4 = sshll.u32 (!%p3910_p6), %s3432_s29, 3 }
  0x94   : > { %s634_s26 = scalar_lea.sflag (!%p3910_p6), [#allocation4], %s3432_s29  ;;  %s637_s5 = scalar_lea.vmem (!%p3910_p6), [#allocation3], %s2487_s4 }
  0x9a   : > { %3012 = dma.done.wait (%p3911_p10), %s634_s26, 128  }
  0x9b   : > { %3014 = vsyncadd (%p3911_p10), %s634_s26, 4294967168  ;;  %s642_s20 = sand.u32 1, %s3225_s17   ;;  %s644_s8 = sand.u32 1, %s3029_s22  }
  0x9c   : > { %s643_s10 = scalar_lea.sflag [#allocation7], %s642_s20  ;;  %s3442_s3 = scalar_lea.vmem [#allocation6], %s644_s8 }
  0x9d   : > { %p3912_p9 = scmp.ne.s32.totalorder %s3885_s15, 0 }
  0x9f   : > { %3016 = dma.done.wait (%p3912_p9), %s643_s10, 32  }
  0xa0   : > { %3018 = vsyncadd (%p3912_p9), %s643_s10, 4294967264  ;;  %p751_p4 = scmp.lt.s32.totalorder %s3053_s28, 1  ;;  %p754_p5 = scmp.lt.s32.totalorder %s3049_s27, 1 }
  0xa1   : > { %s3915_s21 = sld [smem:[#allocation30_spill]]  ;;  %s3918_s24 = sld [smem:[#allocation34_spill]] }
  0xa2   : > { %s3451_s16 = scalar_select %p751_p4, %s3053_s28, 1 }
  0xa3   : > { %s3454_s9 = scalar_select %p754_p5, %s3049_s27, 1 }
  0xa4   : > { %s3919_s13 = sld [smem:[#allocation33_spill]]  ;;  %s3920_s6 = sld [smem:[#allocation35_spill]] }
  0xa5   : > { %s2547_s22 = sshll.u32 %s3454_s9, 4  ;;  %s3921_s17 = sld [smem:[#allocation37_spill]] }
  0xa6   : > { %s2550_s2 = sshll.u32 %s3454_s9, 5  ;;  %s3922_s23 = sld [smem:[#allocation39_spill]] }
  0xa7   : > { %s759_s26 = scalar_lea.vmem %s3915_s21, %s3454_s9  ;;  %s773_s15 = scalar_lea.vmem %s3918_s24, %s3454_s9 }
  0xa8   : > { %s3923_s19 = sld [smem:[#allocation40_spill]]  ;;  %s3506_s1 = scalar_lea.vmem [#allocation9], %s2487_s4 }
  0xa9   : > { %p2497_p1 = scmp.ne.s32.totalorder %s3049_s27, 0 }
  0xaa   : > { %s770_s12 = scalar_lea.vmem %s3919_s13, %s2547_s22  ;;  %s3487_s21 = scalar_lea.vmem %s3920_s6, %s2547_s22  ;;  %v797_v0 = vld [vmem:[%s637_s5] sm:$0xff] (!%p2497_p1)  ;;  %vm798_vm0 = vcmask (!%p2497_p1), 261120  }
  0xab   : > { %s3492_s14 = scalar_lea.vmem %s3921_s17, %s2547_s22  ;;  %s3504_s13 = scalar_lea.vmem [#allocation8], %s644_s8  ;;  %799 = vst.msk [vmem:[#allocation2] sm:$0xff] (!%p2497_p1), %vm798_vm0, %v797_v0 }
  0xac   : > { %s3498_s0 = scalar_lea.vmem %s3922_s23, %s2550_s2  ;;  %796 = sbr.rel (%p2497_p1) target bundleno = 179 (0xb3), region = 100 }
  0xae   : > { %s791_s30 = scalar_lea.vmem %s3923_s19, %s3454_s9 }
  0xb3 PF: > { %v3509_v1 = vld [vmem:[#allocation2] sm:$0xff]  ;;  %vm806_vm1 = vcmask 261120   ;;  %v3070_v9 = vmov 0.0   ;;  %vm3071_vm2 = vmmov 0   ;;  %v2814_v10 = vld [vmem:[%s770_s12 + $0x8] sm:$0xff]   ;;  %s3924_s4 = sld [smem:[#allocation29_spill]]  ;;  %v949_v34 = vlaneseq }
  0xb4   : > { %v807_v2 = vsel %vm806_vm1, %v3509_v1, 0.0  ;;  %v2813_v8 = vld [vmem:[%s770_s12] sm:$0xff]   ;;  %2586 = vmatprep.subr.bf16.mxu1 %v3070_v9  ;;  %2590 = vmatprep.mubr.msk.bf16.mxu1 %vm3071_vm2, %v3070_v9  ;;  %s3072_s17 = smov 80   ;;  %s3074_s2 = smov 88   ;;  %v3079_v32 = vmov 1983009808  }
  0xb5   : > { %808 = vadd.xlane.f32.xlu0 %v807_v2  ;;  %2587 = vmatpush3.bf16.msra.mxu1 %v2813_v8  ;;  %v2500_v22 = vld [vmem:[%s759_s26] ss:$0 sm:$0xff]  ;;  %s3073_s26 = smov 96   ;;  %s3075_s11 = smov 72   ;;  %v947_v33 = vunpack.c.l.s4 %v3079_v32  ;;  %v3080_v36 = vmov 1934713408  }
  0xb6   : > { %2600 = vmatprep.subr.bf16.mxu0 %v3070_v9  ;;  %2588 = vmatprep.subr.bf16.mxu1 %v3070_v9  ;;  %v2501_v26 = vld [vmem:[%s773_s15] ss:$0 sm:$0xff]  ;;  %s3076_s25 = smov 120   ;;  %s3077_s15 = smov 112   ;;  %v1011_v37 = vunpack.c.l.s4 %v3080_v36  ;;  %v3550_v39 = vshrl.u32 %v949_v34, 7  ;;  %vm1364_vm5 = vcmask 64512  }
  0xb7   : > { %2602 = vmatprep.mubr.msk.bf16.mxu0 %vm3071_vm2, %v3070_v9  ;;  %s3078_s7 = smov 104   ;;  %v948_v38 = vunpack.c.0.s8 %v947_v33  ;;  %s3928_s22 = sld [smem:[#allocation28_spill]]  ;;  %vm1614_vm6 = vcmask 1043456   ;;  %vm2148_vm9 = vcmask 523264  }
  0xb8   : > { %v1012_v42 = vunpack.c.0.s8 %v1011_v37  ;;  %s3084_s8 = smov 56   ;;  %s3932_s20 = sld [smem:[#allocation32_spill]] }
  0xb9   : > { %2589 = vmatpush3.bf16.msra.mxu1 %v2814_v10  ;;  %s3925_s5 = scalar_lea.vmem %s3924_s4, %s3454_s9  ;;  %v3553_v43 = vsub.s32 %v948_v38, %v3550_v39  ;;  %s3082_s4 = smov 48  }
  0xba   : > { %2594 = vmatprep.subr.bf16.mxu1 %v3070_v9  ;;  %v2499_v19 = vld [vmem:[%s3925_s5] ss:$0 sm:$0xff]  ;;  %v3556_v49 = vsub.s32 %v1012_v42, %v3550_v39  ;;  %s3083_s5 = smov 40   ;;  %p2540_p11 = scmp.ne.s32.totalorder %s3049_s27, 1 }
  0xbd   : > { %s3929_s23 = scalar_lea.vmem %s3928_s22, %s3451_s16  ;;  %s3081_s16 = smov 64  }
  0xbe   : > { %s3933_s10 = scalar_lea.vmem %s3932_s20, %s3454_s9 }
 0x142   : > { %v809_v3 = vpop.xlane.xlu0 %808 }
 0x143   : > { %v811_v4 = vmul.f32 0.03125, %v809_v3 }
 0x145   : > { %v812_v5 = vsub.f32 %v3509_v1, %v811_v4 }
 0x147   : > { %v813_v6 = vmul.f32 %v812_v5, %v812_v5  ;;  %v834_v20 = vmul.f32 %v2499_v19, %v812_v5 }
 0x149   : > { %v814_v7 = vsel %vm806_vm1, %v813_v6, 0.0 }
 0x14a   : > { %815 = vadd.xlane.f32.xlu0 %v814_v7 }
 0x1d7   : > { %v816_v11 = vpop.xlane.xlu0 %815 }
 0x1d8   : > { %v818_v12 = vmul.f32 0.032258064, %v816_v11 }
 0x1da   : > { %2821 = vrsqrt.f32 %v818_v12  ;;  %vm821_vm3 = vcmp.eq.f32.partialorder %v818_v12, inf  ;;  %v824_v15 = vand.u32 2147483648, %v818_v12  ;;  %vm823_vm4 = vcmp.eq.f32.partialorder %v818_v12, 0.0 }
 0x1e4   : > { %v2822_v13 = vpop.eup %2821 }
 0x1e5   : > { %v820_v14 = vmul.f32 %v2822_v13, %v818_v12 }
 0x1e7   : > { %v822_v16 = vsel %vm821_vm3, %v818_v12, %v820_v14 }
 0x1e8   : > { %v825_v17 = vsel %vm823_vm4, %v824_v15, %v822_v16 }
 0x1e9   : > { %v826_v18 = vadd.f32 1e-06, %v825_v17 }
 0x1eb   : > { %2823 = vrcp.f32 %v826_v18 }
 0x1f5   : > { %v2824_v21 = vpop.eup %2823 }
 0x1f6   : > { %v835_v23 = vmul.f32 %v2824_v21, %v834_v20 }
 0x1f8   : > { %v842_v24 = vadd.f32 %v2500_v22, %v835_v23 }
 0x1fa   : > { %v843_v25 = vpack.c.bf16 %v842_v24, %v842_v24 }
 0x1fc   : > { %2591 = vmatmul.mubr.msk.bf16.vlgmr.msra.gmra.mrb[0].mxu1 %vm806_vm1, %v843_v25 }
 0x1fd   : > { %2596 = vmatprep.mubr.msk.bf16.mxu1 %vm3071_vm2, %v3070_v9 }
 0x2cf   : > { %v904_v27 = vpop.f32.mrb[0].mxu1 }
 0x2d0   : > { %v3541_v28 = vadd.f32 %v2501_v26, %v904_v27  ;;  %v2592_v29 = vpop.f32.mrb[1].mxu1 }
 0x2d1   : > { %v907_v30 = vpop.f32.mrb[2].mxu1 }
 0x2d2   : > { %926 = vrot.lane.b32.xlu0 %v3541_v28, %s3072_s17  ;;  %920 = vrot.lane.b32.xlu1 %v3541_v28, %s3073_s26  ;;  %v2593_v31 = vpop.f32.mrb[3].mxu1 }
 0x2d6   : > { %923 = vrot.lane.b32.xlu1 %v3541_v28, %s3074_s2 }
 0x2da   : > { %929 = vrot.lane.b32.xlu1 %v3541_v28, %s3075_s11  ;;  %s3936_s11 = sld [smem:[#allocation42_spill]] (!%p2540_p11) }
 0x2de   : > { %911 = vrot.lane.b32.xlu1 %v3541_v28, %s3076_s25 }
 0x2e2   : > { %914 = vrot.lane.b32.xlu1 %v3541_v28, %s3077_s15 }
 0x2e6   : > { %917 = vrot.lane.b32.xlu1 %v3541_v28, %s3078_s7 }
 0x344   : > { %v921_v35 = vpop.permute.xlu1 %920  ;;  %v927_v40 = vpop.permute.xlu0 %926 }
 0x345   : > { %v976_v44 = vcombine.low %v921_v35, %v927_v40  ;;  %v977_v45 = vcombine.high %v921_v35, %v927_v40 }
 0x347   : > { %v984_v50 = vrot.slane %v976_v44, %v3553_v43  ;;  %v991_v51 = vrot.slane %v977_v45, %v3553_v43 }
 0x348   : > { %v924_v41 = vpop.permute.xlu1 %923 }
 0x34c   : > { %v930_v46 = vpop.permute.xlu1 %929 }
 0x34d   : > { %v992_v47 = vcombine.low %v924_v41, %v930_v46  ;;  %v993_v48 = vcombine.high %v924_v41, %v930_v46 }
 0x34f   : > { %v1000_v52 = vrot.slane %v992_v47, %v3553_v43  ;;  %v1007_v53 = vrot.slane %v993_v48, %v3553_v43 }
 0x350   : > { %v912_v54 = vpop.permute.xlu1 %911 }
 0x351   : > { %v1040_v55 = vcombine.low %v984_v50, %v1000_v52  ;;  %v1041_v56 = vcombine.high %v984_v50, %v1000_v52  ;;  %v1056_v57 = vcombine.low %v991_v51, %v1007_v53  ;;  %v1057_v58 = vcombine.high %v991_v51, %v1007_v53 }
 0x353   : > { %v1048_v59 = vrot.slane %v1040_v55, %v3556_v49  ;;  %v1055_v60 = vrot.slane %v1041_v56, %v3556_v49  ;;  %v1064_v61 = vrot.slane %v1056_v57, %v3556_v49  ;;  %v1071_v62 = vrot.slane %v1057_v58, %v3556_v49 }
 0x354   : > { %v915_v63 = vpop.permute.xlu1 %914 }
 0x355   : > { %v2506_v0 = vcombine.low %v1048_v59, %v1055_v60  ;;  %v2508_v2 = vcombine.high %v1048_v59, %v1055_v60  ;;  %v2510_v3 = vcombine.low %v1064_v61, %v1071_v62  ;;  %v2512_v4 = vcombine.high %v1064_v61, %v1071_v62 }
 0x356   : > { %v944_v5 = vcombine.low %v3541_v28, %v915_v63  ;;  %v945_v6 = vcombine.high %v3541_v28, %v915_v63 }
 0x357   : > { %v1163_v7 = vrot.slane %v2506_v0, %v3553_v43  ;;  %v1179_v8 = vrot.slane %v2508_v2, %v3553_v43  ;;  %v1195_v10 = vrot.slane %v2510_v3, %v3553_v43  ;;  %v1211_v11 = vrot.slane %v2512_v4, %v3553_v43 }
 0x358   : > { %v918_v12 = vpop.permute.xlu1 %917  ;;  %v952_v17 = vrot.slane %v944_v5, %v3553_v43  ;;  %v959_v18 = vrot.slane %v945_v6, %v3553_v43 }
 0x359   : > { %v960_v13 = vcombine.low %v912_v54, %v918_v12  ;;  %v961_v14 = vcombine.high %v912_v54, %v918_v12  ;;  %v1228_v15 = vcombine.low %v1163_v7, %v1179_v8  ;;  %v1260_v16 = vcombine.low %v1195_v10, %v1211_v11 }
 0x35a   : > { %v1229_v23 = vcombine.high %v1163_v7, %v1179_v8  ;;  %v1261_v24 = vcombine.high %v1195_v10, %v1211_v11 }
 0x35b   : > { %v968_v19 = vrot.slane %v960_v13, %v3553_v43  ;;  %v975_v20 = vrot.slane %v961_v14, %v3553_v43  ;;  %v1236_v21 = vrot.slane %v1228_v15, %v3556_v49  ;;  %v1268_v22 = vrot.slane %v1260_v16, %v3556_v49  ;;  %v801_v13 = vld [vmem:[%s3929_s23] sm:$0x1] }
 0x35c   : > { %v1243_v38 = vrot.slane %v1229_v23, %v3556_v49  ;;  %v1275_v40 = vrot.slane %v1261_v24, %v3556_v49  ;;  %v2498_v14 = vadd.f32 -1.0, %v801_v13  ;;  %v1556_v16 = vsub.s32 0, %v3550_v39 }
 0x35d   : > { %v1008_v25 = vcombine.low %v952_v17, %v968_v19  ;;  %v1009_v26 = vcombine.high %v952_v17, %v968_v19  ;;  %v1024_v27 = vcombine.low %v959_v18, %v975_v20  ;;  %v1025_v29 = vcombine.high %v959_v18, %v975_v20 }
 0x35e   : > { %v1280_v30 = vcombine.low %v1236_v21, %v1268_v22  ;;  %v1281_v31 = vcombine.high %v1236_v21, %v1268_v22  ;;  %v1282_v55 = vcombine.low %v1243_v38, %v1275_v40  ;;  %v1283_v56 = vcombine.high %v1243_v38, %v1275_v40 }
 0x35f   : > { %v1016_v32 = vrot.slane %v1008_v25, %v3556_v49  ;;  %v1023_v33 = vrot.slane %v1009_v26, %v3556_v49  ;;  %v1032_v34 = vrot.slane %v1024_v27, %v3556_v49  ;;  %v1039_v35 = vrot.slane %v1025_v29, %v3556_v49 }
 0x360   : > { %v1356_v36 = vpack.c.bf16 %v1280_v30, %v1280_v30  ;;  %v1357_v37 = vpack.c.bf16 %v1281_v31, %v1281_v31  ;;  %v1358_v63 = vpack.c.bf16 %v1282_v55, %v1282_v55  ;;  %v1359_v0 = vpack.c.bf16 %v1283_v56, %v1283_v56 }
 0x361   : > { %v2505_v41 = vcombine.low %v1016_v32, %v1023_v33  ;;  %v2507_v42 = vcombine.high %v1016_v32, %v1023_v33  ;;  %v2509_v44 = vcombine.low %v1032_v34, %v1039_v35  ;;  %v2511_v45 = vcombine.high %v1032_v34, %v1039_v35 }
 0x362   : > { %v1369_v46 = vsel %vm1364_vm5, %v1356_v36, 0  ;;  %v1415_v47 = vsel %vm1364_vm5, %v1357_v37, 0  ;;  %v1461_v6 = vsel %vm1364_vm5, %v1358_v63, 0  ;;  %v1507_v7 = vsel %vm1364_vm5, %v1359_v0, 0 }
 0x363   : > { %v1156_v48 = vrot.slane %v2505_v41, %v3553_v43  ;;  %v1172_v50 = vrot.slane %v2507_v42, %v3553_v43  ;;  %v1188_v51 = vrot.slane %v2509_v44, %v3553_v43  ;;  %v1204_v52 = vrot.slane %v2511_v45, %v3553_v43  ;;  %2595 = vmatpush3.bf16.xpose.msra.mxu1 %v1369_v46 }
 0x364   : > { %2601 = vmatpush3.bf16.xpose.msra.mxu0 %v1415_v47  ;;  %2606 = vmatprep.subr.bf16.mxu1 %v3070_v9  ;;  %v803_v15 = vmul.f32 1e+09, %v2498_v14 }
 0x365   : > { %v1212_v53 = vcombine.low %v1156_v48, %v1172_v50  ;;  %v1244_v54 = vcombine.low %v1188_v51, %v1204_v52  ;;  %2612 = vmatprep.subr.bf16.mxu0 %v3070_v9  ;;  %v1213_v57 = vcombine.high %v1156_v48, %v1172_v50  ;;  %v1245_v58 = vcombine.high %v1188_v51, %v1204_v52 }
 0x366   : > { %v1557_v17 = vrot.slane %v803_v15, %v1556_v16 }
 0x367   : > { %v1220_v59 = vrot.slane %v1212_v53, %v3556_v49  ;;  %v1252_v60 = vrot.slane %v1244_v54, %v3556_v49  ;;  %v1227_v4 = vrot.slane %v1213_v57, %v3556_v49  ;;  %v1259_v5 = vrot.slane %v1245_v58, %v3556_v49 }
 0x369   : > { %v1276_v61 = vcombine.low %v1220_v59, %v1252_v60  ;;  %v1277_v62 = vcombine.high %v1220_v59, %v1252_v60  ;;  %v1278_v8 = vcombine.low %v1227_v4, %v1259_v5  ;;  %v1279_v10 = vcombine.high %v1227_v4, %v1259_v5 }
 0x36b   : > { %v1352_v2 = vpack.c.bf16 %v1276_v61, %v1276_v61  ;;  %v1353_v3 = vpack.c.bf16 %v1277_v62, %v1277_v62  ;;  %v1354_v11 = vpack.c.bf16 %v1278_v8, %v1278_v8  ;;  %v1355_v12 = vpack.c.bf16 %v1279_v10, %v1279_v10 }
 0x36d   : > { %2597 = vmatmul.mubr.msk.bf16.vlgmr.msra.gmra.mrb[4].mxu1 %vm1364_vm5, %v1352_v2  ;;  %2603 = vmatmul.mubr.msk.bf16.vlgmr.msra.gmra.mrb[0].mxu0 %vm1364_vm5, %v1353_v3 }
 0x36e   : > { %2607 = vmatpush3.bf16.xpose.msra.mxu1 %v1461_v6  ;;  %2613 = vmatpush3.bf16.xpose.msra.mxu0 %v1507_v7 }
 0x36f   : > { %2608 = vmatprep.mubr.msk.bf16.mxu1 %vm3071_vm2, %v3070_v9  ;;  %2614 = vmatprep.mubr.msk.bf16.mxu0 %vm3071_vm2, %v3070_v9 }
 0x370   : > { %2618 = vmatprep.subr.bf16.mxu1 %v3070_v9  ;;  %2624 = vmatprep.subr.bf16.mxu0 %v3070_v9 }
 0x375   : > { %2609 = vmatmul.mubr.msk.bf16.vlgmr.msra.gmra.mrb[8].mxu1 %vm1364_vm5, %v1354_v11  ;;  %2615 = vmatmul.mubr.msk.bf16.vlgmr.msra.gmra.mrb[4].mxu0 %vm1364_vm5, %v1355_v12 }
 0x376   : > { %2620 = vmatprep.mubr.msk.bf16.mxu1 %vm3071_vm2, %v3070_v9  ;;  %2626 = vmatprep.mubr.msk.bf16.mxu0 %vm3071_vm2, %v3070_v9 }
 0x440   : > { %v1405_v18 = vpop.f32.mrb[4].mxu1  ;;  %v1451_v19 = vpop.f32.mrb[0].mxu0 }
 0x441   : > { %v1549_v20 = vmul.f32 0.35355338, %v1405_v18  ;;  %v1550_v21 = vmul.f32 0.35355338, %v1451_v19  ;;  %v2598_v22 = vpop.f32.mrb[5].mxu1  ;;  %v2604_v23 = vpop.f32.mrb[1].mxu0 }
 0x442   : > { %v1408_v24 = vpop.f32.mrb[6].mxu1  ;;  %v1454_v25 = vpop.f32.mrb[2].mxu0 }
 0x443   : > { %v2599_v26 = vpop.f32.mrb[7].mxu1  ;;  %v2605_v27 = vpop.f32.mrb[3].mxu0  ;;  %v1560_v29 = vadd.f32 %v1557_v17, %v1550_v21  ;;  %v1559_v30 = vadd.f32 %v1557_v17, %v1549_v20 }
 0x445   : > { %v1566_v31 = vsel %vm1364_vm5, %v1560_v29, -inf  ;;  %v1563_v32 = vsel %vm1364_vm5, %v1559_v30, -inf }
 0x446   : > { %1567 = vmax.xlane.f32.xlu0 %v1566_v31  ;;  %1564 = vmax.xlane.f32.xlu1 %v1563_v32 }
 0x448   : > { %v1497_v39 = vpop.f32.mrb[8].mxu1  ;;  %v1543_v33 = vpop.f32.mrb[4].mxu0 }
 0x449   : > { %v1551_v34 = vmul.f32 0.35355338, %v1497_v39  ;;  %v1552_v35 = vmul.f32 0.35355338, %v1543_v33  ;;  %v2610_v36 = vpop.f32.mrb[9].mxu1  ;;  %v2616_v37 = vpop.f32.mrb[5].mxu0 }
 0x44a   : > { %v1500_v38 = vpop.f32.mrb[10].mxu1  ;;  %v1546_v40 = vpop.f32.mrb[6].mxu0 }
 0x44b   : > { %v2611_v41 = vpop.f32.mrb[11].mxu1  ;;  %v2617_v42 = vpop.f32.mrb[7].mxu0  ;;  %v1562_v44 = vadd.f32 %v1557_v17, %v1552_v35  ;;  %v1561_v45 = vadd.f32 %v1557_v17, %v1551_v34 }
 0x44d   : > { %v1572_v46 = vsel %vm1364_vm5, %v1562_v44, -inf  ;;  %v1569_v47 = vsel %vm1364_vm5, %v1561_v45, -inf }
 0x44e   : > { %1573 = vmax.xlane.f32.xlu0 %v1572_v46  ;;  %1570 = vmax.xlane.f32.xlu1 %v1569_v47 }
 0x45f   : > { %932 = vrot.lane.b32.xlu1 %v3541_v28, %s3081_s16 }
 0x4d3   : > { %v1568_v48 = vpop.xlane.xlu0 %1567  ;;  %v1565_v50 = vpop.xlane.xlu1 %1564 }
 0x4d4   : > { %v1576_v51 = vsub.f32 %v1560_v29, %v1568_v48  ;;  %v1575_v52 = vsub.f32 %v1559_v30, %v1565_v50 }
 0x4d6   : > { %v1581_v53 = vmul.f32 1.442695, %v1576_v51  ;;  %v1579_v54 = vmul.f32 1.442695, %v1575_v52 }
 0x4d8   : > { %2825 = vpow2.f32 %v1581_v53 }
 0x4d9   : > { %2827 = vpow2.f32 %v1579_v54 }
 0x4db   : > { %v1571_v59 = vpop.xlane.xlu1 %1570  ;;  %v1574_v61 = vpop.xlane.xlu0 %1573 }
 0x4dc   : > { %v1577_v60 = vsub.f32 %v1561_v45, %v1571_v59  ;;  %v1578_v63 = vsub.f32 %v1562_v44, %v1574_v61 }
 0x4de   : > { %v1583_v62 = vmul.f32 1.442695, %v1577_v60  ;;  %v1585_v0 = vmul.f32 1.442695, %v1578_v63 }
 0x4e0   : > { %2829 = vpow2.f32 %v1583_v62 }
 0x4e1   : > { %2831 = vpow2.f32 %v1585_v0 }
 0x4e2   : > { %v3623_v55 = vpop.eup %2825 }
 0x4e3   : > { %v3625_v56 = vpop.eup %2827  ;;  %v1590_v57 = vsel %vm1364_vm5, %v3623_v55, 0.0 }
 0x4e4   : > { %1591 = vadd.xlane.f32.xlu0 %v1590_v57  ;;  %v1587_v58 = vsel %vm1364_vm5, %v3625_v56, 0.0 }
 0x4e5   : > { %1588 = vadd.xlane.f32.xlu1 %v1587_v58 }
 0x4ea   : > { %v3634_v2 = vpop.eup %2829 }
 0x4eb   : > { %v1593_v3 = vsel %vm1364_vm5, %v3634_v2, 0.0  ;;  %v3638_v4 = vpop.eup %2831 }
 0x4ec   : > { %v1596_v5 = vsel %vm1364_vm5, %v3638_v4, 0.0 }
 0x4f6   : > { %938 = vrot.lane.b32.xlu1 %v3541_v28, %s3082_s4 }
 0x4fa   : > { %941 = vrot.lane.b32.xlu1 %v3541_v28, %s3083_s5  ;;  %935 = vrot.lane.b32.xlu0 %v3541_v28, %s3084_s8  ;;  %v933_v28 = vpop.permute.xlu1 %932 }
 0x519   : > { %1594 = vadd.xlane.f32.xlu0 %v1593_v3 }
 0x51e   : > { %1597 = vadd.xlane.f32.xlu1 %v1596_v5 }
 0x571   : > { %v1592_v7 = vpop.xlane.xlu0 %1591 }
 0x572   : > { %v1589_v6 = vpop.xlane.xlu1 %1588  ;;  %2833 = vrcp.f32 %v1592_v7 }
 0x573   : > { %2835 = vrcp.f32 %v1589_v6 }
 0x575   : > { %v936_v12 = vpop.permute.xlu0 %935 }
 0x576   : > { %v939_v8 = vpop.permute.xlu1 %938 }
 0x577   : > { %v1080_v10 = vcombine.low %v933_v28, %v939_v8  ;;  %v1081_v11 = vcombine.high %v933_v28, %v939_v8 }
 0x579   : > { %v1088_v16 = vrot.slane %v1080_v10, %v3553_v43  ;;  %v1095_v17 = vrot.slane %v1081_v11, %v3553_v43  ;;  %v1800_v10 = vld [vmem:[%s3487_s21] sm:$0xf]  ;;  %v1801_v11 = vld [vmem:[%s3487_s21 + $0x4] sm:$0xf] }
 0x57a   : > { %v942_v13 = vpop.permute.xlu1 %941 }
 0x57b   : > { %v1096_v14 = vcombine.low %v936_v12, %v942_v13  ;;  %v1097_v15 = vcombine.high %v936_v12, %v942_v13  ;;  %v1854_v12 = vsel %vm1614_vm6, %v1801_v11, 0  ;;  %v1803_v13 = vld [vmem:[%s3487_s21 + $0xc] sm:$0xf] }
 0x57c   : > { %v2834_v41 = vpop.eup %2833 }
 0x57d   : > { %v1104_v18 = vrot.slane %v1096_v14, %v3553_v43  ;;  %v1111_v19 = vrot.slane %v1097_v15, %v3553_v43  ;;  %v2836_v47 = vpop.eup %2835 }
 0x57e   : > { %v1603_v53 = vmul.f32 %v2836_v47, %v3625_v56 }
 0x57f   : > { %v1112_v20 = vcombine.low %v1088_v16, %v1104_v18  ;;  %v1113_v21 = vcombine.high %v1088_v16, %v1104_v18  ;;  %v1128_v22 = vcombine.low %v1095_v17, %v1111_v19  ;;  %v1129_v23 = vcombine.high %v1095_v17, %v1111_v19 }
 0x581   : > { %v1120_v24 = vrot.slane %v1112_v20, %v3556_v49  ;;  %v1127_v25 = vrot.slane %v1113_v21, %v3556_v49  ;;  %v1136_v26 = vrot.slane %v1128_v22, %v3556_v49  ;;  %v1143_v27 = vrot.slane %v1129_v23, %v3556_v49 }
 0x582   : > { %v1946_v21 = vsel %vm1614_vm6, %v1803_v13, 0 }
 0x583   : > { %v1284_v29 = vcombine.low %v1120_v24, %v1127_v25  ;;  %v2513_v30 = vcombine.high %v1120_v24, %v1127_v25  ;;  %v1300_v31 = vcombine.low %v1136_v26, %v1143_v27  ;;  %v2514_v32 = vcombine.high %v1136_v26, %v1143_v27 }
 0x585   : > { %v1291_v39 = vrot.slane %v1284_v29, %v3553_v43  ;;  %v1299_v33 = vrot.slane %v2513_v30, %v3553_v43  ;;  %v1307_v34 = vrot.slane %v1300_v31, %v3553_v43  ;;  %v1315_v35 = vrot.slane %v2514_v32, %v3553_v43 }
 0x586   : > { %v1604_v43 = vmul.f32 %v2834_v41, %v3623_v55 }
 0x587   : > { %v1316_v36 = vcombine.low %v1291_v39, %v1299_v33  ;;  %v1332_v37 = vcombine.low %v1307_v34, %v1315_v35  ;;  %v1317_v38 = vcombine.high %v1291_v39, %v1299_v33  ;;  %v1333_v40 = vcombine.high %v1307_v34, %v1315_v35 }
 0x588   : > { %v1608_v62 = vpack.c.bf16 %v1604_v43, %v1604_v43 }
 0x589   : > { %v1324_v42 = vrot.slane %v1316_v36, %v3556_v49  ;;  %v1340_v44 = vrot.slane %v1332_v37, %v3556_v49  ;;  %v1331_v45 = vrot.slane %v1317_v38, %v3556_v49  ;;  %v1347_v46 = vrot.slane %v1333_v40, %v3556_v49 }
 0x58a   : > { %v1607_v49 = vpack.c.bf16 %v1603_v53, %v1603_v53 }
 0x58b   : > { %v1348_v48 = vcombine.low %v1324_v42, %v1340_v44  ;;  %v1349_v50 = vcombine.high %v1324_v42, %v1340_v44  ;;  %v1350_v51 = vcombine.low %v1331_v45, %v1347_v46  ;;  %v1351_v52 = vcombine.high %v1331_v45, %v1347_v46 }
 0x58d   : > { %v1360_v54 = vpack.c.bf16 %v1348_v48, %v1348_v48  ;;  %v1361_v57 = vpack.c.bf16 %v1349_v50, %v1349_v50  ;;  %v1362_v60 = vpack.c.bf16 %v1350_v51, %v1350_v51  ;;  %v1363_v61 = vpack.c.bf16 %v1351_v52, %v1351_v52 }
 0x58f   : > { %v1616_v58 = vsel %vm1614_vm6, %v1360_v54, 0  ;;  %v1662_v59 = vsel %vm1614_vm6, %v1361_v57, 0  ;;  %v1708_v55 = vsel %vm1614_vm6, %v1362_v60, 0  ;;  %v1754_v56 = vsel %vm1614_vm6, %v1363_v61, 0 }
 0x590   : > { %2619 = vmatpush3.bf16.msra.mxu1 %v1616_v58  ;;  %2625 = vmatpush3.bf16.msra.mxu0 %v1662_v59  ;;  %v2527_v59 = vld [vmem:[%s3442_s3] ss:$0 sm:$0xff] }
 0x591   : > { %2630 = vmatprep.subr.bf16.mxu1 %v3070_v9  ;;  %2636 = vmatprep.subr.bf16.mxu0 %v3070_v9 }
 0x593   : > { %2621 = vmatmul.mubr.msk.bf16.vlgmr.msra.gmra.mrb[12].mxu1 %vm1364_vm5, %v1607_v49  ;;  %2627 = vmatmul.mubr.msk.bf16.vlgmr.msra.gmra.mrb[8].mxu0 %vm1364_vm5, %v1608_v62 }
 0x594   : > { %2631 = vmatpush3.bf16.msra.mxu1 %v1708_v55  ;;  %2637 = vmatpush3.bf16.msra.mxu0 %v1754_v56 }
 0x595   : > { %2632 = vmatprep.mubr.msk.bf16.mxu1 %vm3071_vm2, %v3070_v9  ;;  %2638 = vmatprep.mubr.msk.bf16.mxu0 %vm3071_vm2, %v3070_v9 }
 0x596   : > { %2642 = vmatprep.subr.bf16.mxu1 %v3070_v9  ;;  %2648 = vmatprep.subr.bf16.mxu0 %v3070_v9 }
 0x5a6   : > { %v1595_v63 = vpop.xlane.xlu0 %1594 }
 0x5a7   : > { %2837 = vrcp.f32 %v1595_v63 }
 0x5ab   : > { %v1598_v0 = vpop.xlane.xlu1 %1597 }
 0x5ac   : > { %2839 = vrcp.f32 %v1598_v0 }
 0x5b1   : > { %v2838_v3 = vpop.eup %2837 }
 0x5b2   : > { %v1605_v5 = vmul.f32 %v2838_v3, %v3634_v2  ;;  %v1808_v2 = vsel %vm1614_vm6, %v1800_v10, 0  ;;  %v2817_v10 = vld [vmem:[%s3498_s0] sm:$0xff]  }
 0x5b4   : > { %v1609_v28 = vpack.c.bf16 %v1605_v5, %v1605_v5 }
 0x5b6   : > { %v2840_v6 = vpop.eup %2839  ;;  %2633 = vmatmul.mubr.msk.bf16.vlgmr.msra.gmra.mrb[16].mxu1 %vm1364_vm5, %v1609_v28 }
 0x5b7   : > { %v1606_v7 = vmul.f32 %v2840_v6, %v3638_v4  ;;  %2644 = vmatprep.mubr.msk.bf16.mxu1 %vm3071_vm2, %v3070_v9  ;;  %2643 = vmatpush3.bf16.msra.mxu1 %v1808_v2  ;;  %v1802_v4 = vld [vmem:[%s3487_s21 + $0x8] sm:$0xf]  ;;  %s3930_s21 = sld [smem:[#allocation31_spill]] }
 0x5b8   : > { %2654 = vmatprep.subr.bf16.mxu1 %v3070_v9  ;;  %v1900_v20 = vsel %vm1614_vm6, %v1802_v4, 0 }
 0x5b9   : > { %v1610_v8 = vpack.c.bf16 %v1606_v7, %v1606_v7  ;;  %v2815_v7 = vld [vmem:[%s3492_s14] sm:$0xff]  }
 0x5bb   : > { %2639 = vmatmul.mubr.msk.bf16.vlgmr.msra.gmra.mrb[12].mxu0 %vm1364_vm5, %v1610_v8  ;;  %v2816_v8 = vld [vmem:[%s3492_s14 + $0x8] sm:$0xff]  }
 0x5bc   : > { %2650 = vmatprep.mubr.msk.bf16.mxu0 %vm3071_vm2, %v3070_v9  ;;  %2649 = vmatpush3.bf16.msra.mxu0 %v1854_v12 }
 0x5bd   : > { %2660 = vmatprep.subr.bf16.mxu0 %v3070_v9  ;;  %s3931_s12 = scalar_lea.vmem %s3930_s21, %s3454_s9 }
 0x666   : > { %v1652_v14 = vpop.f32.mrb[12].mxu1  ;;  %v1698_v15 = vpop.f32.mrb[8].mxu0 }
 0x667   : > { %v1796_v16 = vpack.c.bf16 %v1652_v14, %v1652_v14  ;;  %v1797_v17 = vpack.c.bf16 %v1698_v15, %v1698_v15  ;;  %v2622_v18 = vpop.f32.mrb[13].mxu1  ;;  %v2628_v19 = vpop.f32.mrb[9].mxu0 }
 0x668   : > { %v1655_v22 = vpop.f32.mrb[14].mxu1  ;;  %v1701_v23 = vpop.f32.mrb[10].mxu0 }
 0x669   : > { %v2623_v24 = vpop.f32.mrb[15].mxu1  ;;  %v2629_v25 = vpop.f32.mrb[11].mxu0  ;;  %2645 = vmatmul.mubr.msk.bf16.vlgmr.msra.gmra.mrb[20].mxu1 %vm1364_vm5, %v1796_v16  ;;  %2651 = vmatmul.mubr.msk.bf16.vlgmr.msra.gmra.mrb[16].mxu0 %vm1364_vm5, %v1797_v17  ;;  %v2528_v17 = vld [vmem:[%s3931_s12] ss:$0 sm:$0xff] }
 0x66a   : > { %2655 = vmatpush3.bf16.msra.mxu1 %v1900_v20  ;;  %2661 = vmatpush3.bf16.msra.mxu0 %v1946_v21  ;;  %v2529_v20 = vld [vmem:[%s3933_s10] ss:$0 sm:$0xff]  ;;  %v2819_v24 = vld [vmem:[%s3498_s0 + $0x10] sm:$0xff]   ;;  %v2820_v25 = vld [vmem:[%s3498_s0 + $0x18] sm:$0xff]  }
 0x66b   : > { %2656 = vmatprep.mubr.msk.bf16.mxu1 %vm3071_vm2, %v3070_v9  ;;  %2662 = vmatprep.mubr.msk.bf16.mxu0 %vm3071_vm2, %v3070_v9 }
 0x66c   : > { %2666 = vmatprep.subr.bf16.mxu1 %v3070_v9  ;;  %2674 = vmatprep.subr.bf16.mxu0 %v3070_v9 }
 0x689   : > { %v1744_v26 = vpop.f32.mrb[16].mxu1 }
 0x68a   : > { %v1798_v27 = vpack.c.bf16 %v1744_v26, %v1744_v26  ;;  %v2634_v29 = vpop.f32.mrb[17].mxu1  ;;  %v2530_v26 = vld [vmem:[%s3504_s13] ss:$0 sm:$0xff] }
 0x68b   : > { %v1747_v30 = vpop.f32.mrb[18].mxu1 }
 0x68c   : > { %v2635_v31 = vpop.f32.mrb[19].mxu1  ;;  %2657 = vmatmul.mubr.msk.bf16.vlgmr.msra.gmra.mrb[24].mxu1 %vm1364_vm5, %v1798_v27 }
 0x68d   : > { %2670 = vmatprep.mubr.msk.bf16.mxu1 %vm3071_vm2, %v3070_v9  ;;  %2667 = vmatpush3.bf16.msra.mxu1 %v2815_v7 }
 0x68e   : > { %v1790_v32 = vpop.f32.mrb[12].mxu0  ;;  %2668 = vmatprep.subr.bf16.mxu1 %v3070_v9 }
 0x68f   : > { %v1799_v39 = vpack.c.bf16 %v1790_v32, %v1790_v32  ;;  %v2640_v33 = vpop.f32.mrb[13].mxu0 }
 0x690   : > { %v1793_v34 = vpop.f32.mrb[14].mxu0 }
 0x691   : > { %v2641_v35 = vpop.f32.mrb[15].mxu0  ;;  %2663 = vmatmul.mubr.msk.bf16.vlgmr.msra.gmra.mrb[20].mxu0 %vm1364_vm5, %v1799_v39  ;;  %2669 = vmatpush3.bf16.msra.mxu1 %v2816_v8  ;;  %v2534_v34 = vld [vmem:[%s791_s30] ss:$0 sm:$0xff] }
 0x692   : > { %2682 = vmatprep.mubr.msk.bf16.mxu0 %vm3071_vm2, %v3070_v9  ;;  %2675 = vmatpush3.bf16.msra.mxu0 %v2817_v10 }
 0x693   : > { %2676 = vmatprep.subr.bf16.mxu0 %v3070_v9 }
 0x73c   : > { %v1844_v36 = vpop.f32.mrb[20].mxu1  ;;  %v1890_v37 = vpop.f32.mrb[16].mxu0 }
 0x73d   : > { %v1988_v38 = vsel %vm806_vm1, %v1844_v36, 0.0  ;;  %v1989_v40 = vsel %vm806_vm1, %v1890_v37, 0.0  ;;  %v2646_v41 = vpop.f32.mrb[21].mxu1  ;;  %v2652_v42 = vpop.f32.mrb[17].mxu0 }
 0x73e   : > { %v1990_v44 = vadd.f32 %v1989_v40, %v1988_v38  ;;  %v1847_v45 = vpop.f32.mrb[22].mxu1  ;;  %v1893_v46 = vpop.f32.mrb[18].mxu0 }
 0x73f   : > { %v2647_v47 = vpop.f32.mrb[23].mxu1  ;;  %v2653_v48 = vpop.f32.mrb[19].mxu0 }
 0x75f   : > { %v1936_v50 = vpop.f32.mrb[24].mxu1 }
 0x760   : > { %v1991_v51 = vsel %vm806_vm1, %v1936_v50, 0.0  ;;  %v2658_v52 = vpop.f32.mrb[25].mxu1 }
 0x761   : > { %v1992_v43 = vadd.f32 %v1991_v51, %v1990_v44  ;;  %v1939_v53 = vpop.f32.mrb[26].mxu1 }
 0x762   : > { %v2659_v54 = vpop.f32.mrb[27].mxu1 }
 0x764   : > { %v1982_v57 = vpop.f32.mrb[20].mxu0 }
 0x765   : > { %v1993_v58 = vsel %vm806_vm1, %v1982_v57, 0.0  ;;  %v2664_v60 = vpop.f32.mrb[21].mxu0 }
 0x766   : > { %v1994_v61 = vadd.f32 %v1993_v58, %v1992_v43  ;;  %v1985_v49 = vpop.f32.mrb[22].mxu0 }
 0x767   : > { %v2665_v62 = vpop.f32.mrb[23].mxu0 }
 0x768   : > { %v2002_v55 = vadd.f32 %v2527_v59, %v1994_v61  ;;  %v2542_v61 = vld [vmem:[%s3936_s11] ss:$0 sm:$0xff] (!%p2540_p11) }
 0x76a   : > { %v2003_v56 = vadd.f32 %v2002_v55, %v3509_v1  ;;  %v2818_v1 = vld [vmem:[%s3498_s0 + $0x8] sm:$0xff]   ;;  %s3935_s0 = sld [smem:[#allocation41_spill]] (!%p2540_p11) }
 0x76b   : > { %2677 = vmatpush3.bf16.msra.mxu0 %v2818_v1 }
 0x76c   : > { %v2006_v63 = vsel %vm806_vm1, %v2003_v56, 0.0  ;;  %2678 = vmatprep.subr.bf16.mxu0 %v3070_v9 }
 0x76d   : > { %2007 = vadd.xlane.f32.xlu0 %v2006_v63 }
 0x76f   : > { %2679 = vmatpush3.bf16.msra.mxu0 %v2819_v24 }
 0x770   : > { %2680 = vmatprep.subr.bf16.mxu0 %v3070_v9  ;;  %v2541_v58 = vld [vmem:[%s3935_s0] ss:$0 sm:$0xff] (!%p2540_p11) }
 0x773   : > { %2681 = vmatpush3.bf16.msra.mxu0 %v2820_v25 }
 0x7fa   : > { %v2008_v0 = vpop.xlane.xlu0 %2007 }
 0x7fb   : > { %v2009_v3 = vmul.f32 0.03125, %v2008_v0 }
 0x7fd   : > { %v2010_v5 = vsub.f32 %v2003_v56, %v2009_v3 }
 0x7ff   : > { %v2011_v28 = vmul.f32 %v2010_v5, %v2010_v5  ;;  %v2031_v18 = vmul.f32 %v2528_v17, %v2010_v5 }
 0x801   : > { %v2012_v6 = vsel %vm806_vm1, %v2011_v28, 0.0 }
 0x802   : > { %2013 = vadd.xlane.f32.xlu0 %v2012_v6 }
 0x88f   : > { %v2014_v11 = vpop.xlane.xlu0 %2013 }
 0x890   : > { %v2015_v2 = vmul.f32 0.032258064, %v2014_v11 }
 0x892   : > { %2841 = vrsqrt.f32 %v2015_v2  ;;  %vm2018_vm7 = vcmp.eq.f32.partialorder %v2015_v2, inf  ;;  %v2021_v13 = vand.u32 2147483648, %v2015_v2  ;;  %vm2020_vm8 = vcmp.eq.f32.partialorder %v2015_v2, 0.0 }
 0x89c   : > { %v2842_v12 = vpop.eup %2841 }
 0x89d   : > { %v2017_v4 = vmul.f32 %v2842_v12, %v2015_v2 }
 0x89f   : > { %v2019_v14 = vsel %vm2018_vm7, %v2015_v2, %v2017_v4 }
 0x8a0   : > { %v2022_v15 = vsel %vm2020_vm8, %v2021_v13, %v2019_v14 }
 0x8a1   : > { %v2023_v16 = vadd.f32 1e-06, %v2022_v15 }
 0x8a3   : > { %2843 = vrcp.f32 %v2023_v16 }
 0x8ad   : > { %v2844_v19 = vpop.eup %2843 }
 0x8ae   : > { %v2032_v21 = vmul.f32 %v2844_v19, %v2031_v18 }
 0x8b0   : > { %v2039_v22 = vadd.f32 %v2529_v20, %v2032_v21 }
 0x8b2   : > { %v2040_v23 = vpack.c.bf16 %v2039_v22, %v2039_v22 }
 0x8b4   : > { %2671 = vmatmul.mubr.msk.bf16.vlgmr.msra.gmra.mrb[28].mxu1 %vm806_vm1, %v2040_v23 }
 0x987   : > { %v2101_v27 = vpop.f32.mrb[28].mxu1 }
 0x988   : > { %v2102_v29 = vadd.f32 %v2530_v26, %v2101_v27  ;;  %v2672_v30 = vpop.f32.mrb[29].mxu1 }
 0x989   : > { %v2104_v31 = vpop.f32.mrb[30].mxu1 }
 0x98a   : > { %v2107_v32 = vmax.f32 %v2102_v29, 0.0  ;;  %v2673_v39 = vpop.f32.mrb[31].mxu1 }
 0x98c   : > { %v2108_v33 = vpack.c.bf16 %v2107_v32, %v2107_v32 }
 0x98e   : > { %2683 = vmatmul.mubr.msk.bf16.vlgmr.msra.gmra.mrb[24].mxu0 %vm2148_vm9, %v2108_v33 }
 0xa60   : > { %2197 = sbr.rel (%p2540_p11) target bundleno = 2989 (0xbad), region = 104 }
 0xa61   : > { %v2186_v35 = vpop.f32.mrb[24].mxu0 }
 0xa62   : > { %v2187_v36 = vadd.f32 %v2534_v34, %v2186_v35  ;;  %v2684_v9 = vpop.f32.mrb[25].mxu0 }
 0xa63   : > { %v2189_v37 = vpop.f32.mrb[26].mxu0 }
 0xa64   : > { %v2192_v38 = vadd.f32 %v2187_v36, %v2003_v56  ;;  %v2685_v40 = vpop.f32.mrb[27].mxu0 }
 0xa66   : > { %2193 = vst.msk [vmem:[#allocation2] sm:$0xff] %vm806_vm1, %v2192_v38  ;;  %v2200_v41 = vsel (!%p2540_p11), %vm806_vm1, %v2192_v38, 0.0 }
 0xa67   : > { %2201 = vadd.xlane.f32.xlu0 %v2200_v41 }
 0xaf4   : > { %v2202_v42 = vpop.xlane.xlu0 %2201 }
 0xaf5   : > { %v2203_v44 = vmul.f32 0.03125, %v2202_v42 }
 0xaf7   : > { %v2204_v45 = vsub.f32 %v2192_v38, %v2203_v44 }
 0xaf9   : > { %v2205_v46 = vmul.f32 %v2204_v45, %v2204_v45  ;;  %v2225_v59 = vmul.f32 %v2541_v58, %v2204_v45 }
 0xafb   : > { %v2206_v47 = vsel %vm806_vm1, %v2205_v46, 0.0 }
 0xafc   : > { %2207 = vadd.xlane.f32.xlu0 %v2206_v47 }
 0xb89   : > { %v2208_v48 = vpop.xlane.xlu0 %2207 }
 0xb8a   : > { %v2209_v50 = vmul.f32 0.032258064, %v2208_v48 }
 0xb8c   : > { %2845 = vrsqrt.f32 %v2209_v50  ;;  %vm2212_vm10 = vcmp.eq.f32.partialorder %v2209_v50, inf  ;;  %v2215_v43 = vand.u32 2147483648, %v2209_v50  ;;  %vm2214_vm11 = vcmp.eq.f32.partialorder %v2209_v50, 0.0 }
 0xb96   : > { %v2846_v51 = vpop.eup %2845 }
 0xb97   : > { %v2211_v52 = vmul.f32 %v2846_v51, %v2209_v50 }
 0xb99   : > { %v2213_v53 = vsel %vm2212_vm10, %v2209_v50, %v2211_v52 }
 0xb9a   : > { %v2216_v54 = vsel %vm2214_vm11, %v2215_v43, %v2213_v53 }
 0xb9b   : > { %v2217_v57 = vadd.f32 1e-06, %v2216_v54 }
 0xb9d   : > { %2847 = vrcp.f32 %v2217_v57 }
 0xba7   : > { %v2848_v60 = vpop.eup %2847 }
 0xba8   : > { %v2226_v49 = vmul.f32 %v2848_v60, %v2225_v59 }
 0xbaa   : > { %v2233_v62 = vadd.f32 %v2542_v61, %v2226_v49 }
 0xbac   : > { %2234 = vst.msk [vmem:[%s3506_s1] sm:$0xff] %vm806_vm1, %v2233_v62 }
 0xbad PF: > { %s3937_s25 = sld [smem:[#allocation24_spill]]  ;;  %s2544_s15 = sshll.u32 %s3053_s28, 7 }
 0xbae   : > { %s3938_s19 = sld [smem:[#allocation43_spill]]  ;;  %s2249_s23 = sshll.u32 %s3506_s1, 4  ;;  %s2250_s23 = int_to_ptr.vmem [resolvable:$true] %s2249_s23 }
 0xbaf   : > { %s2236_s16 = scalar_lea.sflag [#allocation5], %s3432_s29  ;;  %s2939_s4 = scalar_lea.vmem %s2250_s23, 128 }
 0xbb0   : > { %p2940_p7 = scmp.ne.s32.totalorder %s2250_s23, %s2939_s4  ;;  %s3085_s5 = smov [#allocation9]  }
 0xbb1   : > { %s2943_s8 = sshll.u32 %s3085_s5, 4  ;;  %s2944_s8 = int_to_ptr.vmem [resolvable:$false] %s2943_s8 }
 0xbb2   : > { %s2945_s3 = scalar_lea.vmem %s2944_s8, 256  ;;  %p2946_p12 = scmp.lt.s32.totalorder %s2250_s23, %s2944_s8 }
 0xbb3   : > { %p3939_p13 = scmp.ne.s32.totalorder %s3937_s25, 0  ;;  %p2947_p8 = scmp.lt.s32.totalorder %s2945_s3, %s2939_s4 }
 0xbb4   : > { %s3757_s22 = scalar_lea.hbm %s3938_s19, %s2544_s15 }
 0xbb5   : > { %p2941_p0 = pnand %p2940_p7, %p3939_p13  ;;  %p2948_p2 = por %p2947_p8, %p2946_p12 }
 0xbb7   : > { %p2942_p3 = pneg %p2941_p0 }
 0xbb9   : > { %p2949_p6 = pnand %p2948_p2, %p2942_p3 }
 0xbbb   : > { %2952 = shalt.err (!%p2949_p6)
}
 0xbbc   : > { %s2953_s28 = scalar_lea.hbm %s3757_s22, 128  ;;  %s2957_s14 = scalar_lea.hbm %s3938_s19, 256 }
 0xbbd   : > { %p2954_p10 = scmp.ne.s32.totalorder %s3757_s22, %s2953_s28  ;;  %p2958_p5 = scmp.lt.u32.totalorder %s3757_s22, %s3938_s19 }
 0xbbe   : > { %p2959_p1 = scmp.lt.u32.totalorder %s2957_s14, %s2953_s28  ;;  %p2961_p7 = scmp.lt.u32.totalorder %s2953_s28, %s3757_s22 }
 0xbbf   : > { %p2955_p9 = pnand %p2954_p10, %p3939_p13 }
 0xbc0   : > { %p2960_p11 = por %p2959_p1, %p2958_p5 }
 0xbc1   : > { %p2956_p4 = pneg %p2955_p9 }
 0xbc2   : > { %p2962_p0 = por %p2961_p7, %p2960_p11 }
 0xbc4   : > { %p2963_p3 = pnand %p2962_p0, %p2956_p4 }
 0xbc6   : > { %2966 = shalt.err (!%p2963_p3)
}
 0xbc7   : > { %2692 = dma.vmem_to_hbm [thread:$0]  (%p3939_p13), %s2250_s23, 128, %s3757_s22, %s2236_s16  }
 0xbc8 PF: > { %s3940_s18 = sld [smem:[#allocation20_spill]]  ;;  %s3941_s6 = sld [smem:[#allocation15_spill]] }
 0xbc9   : > { %s3942_s20 = sld [smem:[#allocation25_spill]] }
 0xbce   : > { %p2709_p12 = scmp.ge.s32.totalorder %s3940_s18, 2  ;;  %s2261_s10 = sand.u32 1, %s3941_s6  }
 0xbcf   : > { %p3943_p8 = scmp.ne.s32.totalorder %s3942_s20, 0  ;;  %s2262_s17 = scalar_lea.sflag [#allocation5], %s2261_s10 }
 0xbd1   : > { %p2705_p2 = pnand %p2709_p12, %p3943_p8 }
 0xbd3   : > { %3020 = dma.done.wait (!%p2705_p2), %s2262_s17, 128  }
 0xbd4   : > { %3022 = vsyncadd (!%p2705_p2), %s2262_s17, 4294967168  ;;  %s35_s0 = sadd.s32 1, %s3940_s18   ;;  %s3944_s21 = sld [smem:[#allocation13_spill]] }
 0xbd5   : > { %p32_p6 = scmp.ge.s32.totalorder %s35_s0, 6   ;;  %s3945_s22 = sld [smem:[#allocation14_spill]] }
 0xbd6   : > { %s3946_s23 = sld [smem:[#allocation22_spill]]  ;;  %s3947_s24 = sld [smem:[#allocation16_spill]] }
 0xbd7   : > { %s3948_s25 = sld [smem:[#allocation17_spill]]  ;;  %s3949_s26 = sld [smem:[#allocation26_spill]] }
 0xbd8   : > { %s3950_s27 = sld [smem:[#allocation18_spill]]  ;;  %s3951_s28 = sld [smem:[#allocation19_spill]] }
 0xbd9   : > { %s3952_s29 = sld [smem:[#allocation21_spill]]  ;;  %s3953_s30 = sld [smem:[#allocation23_spill]] }
 0xbda   :  { %34 = sbr.rel (!%p32_p6) target bundleno = 29 (0x1d), region = 194 }
 0xbe1   :  { %2267 = vsyncpa [#allocation4], 1 }
 0xbe2   :  { %2269 = vsyncpa [#allocation4 + $0x1], 1 }
 0xbe3   :  { %2270 = vsyncpa [#allocation7], 1 }
 0xbe4   :  { %2272 = vsyncpa [#allocation7 + $0x1], 1 }
 0xbe5   :  { %2273 = vsyncpa [#allocation5], 1 }
 0xbe6   :  { %2275 = vsyncpa [#allocation5 + $0x1], 1 }

</bundles_post_ra>
